<compile_context>
chip_gen: v5e
topology: v5e:2x2
jax: 0.10.0
libtpu: 0.0.40
codegen_flags: <defaults>
</compile_context>

<pallas_src>
import functools

import jax
import jax.numpy as jnp
from jax.experimental import pallas as pl
from jax.experimental.pallas import tpu as pltpu

LEAKY_SLOPE = 0.01   # nn.LeakyReLU default negative_slope
BN_EPS = 1e-5        # nn.BatchNorm2d default eps


# ----------------------------------------------------------------------------
# Tiling / VMEM-budget helpers
# ----------------------------------------------------------------------------
def _vmem_cap_bytes():
    """Best-effort physical VMEM capacity; conservative 64 MiB fallback (v7x)."""
    try:
        info = pltpu.get_tpu_info()
        cap = int(getattr(info, "vmem_capacity_bytes", 0) or 0)
        if cap >= (32 << 20):
            return cap
    except Exception:
        pass
    return 64 << 20


def _channel_tile(c):
    """256-wide tile for the 256x256 MXUs (v6e/v7x) when it divides c, else 128, else full."""
    for t in (256, 128):
        if c % t == 0:
            return t
    return c


def _divisor_tile(n, target):
    """Largest divisor of n that is <= target (>= 1)."""
    t = max(1, min(int(target), n))
    while n % t:
        t -= 1
    return t


def _clamp_vmem_limit(need, cap):
    """1.5x headroom over the computed need, clamped below physical VMEM."""
    limit = need * 3 // 2 + (4 << 20)
    limit = min(limit, cap - (8 << 20), 100 << 20)
    return int(max(limit, 16 << 20))


def _conv_vmem_need(Hp, Wp, HW, W, tcin, tcout, comp_isz, inter_isz, n_ci):
    blocks = (Hp * Wp * tcin * comp_isz            # padded-input block
              + 9 * tcin * tcout * comp_isz        # weight block
              + HW * tcout * inter_isz             # conv-out block
              + 2 * tcout * 4)                     # sum / sumsq blocks
    temps = Hp * W * tcin * comp_isz + HW * tcout * 4   # per-kx band + local f32 acc
    scratch = 0 if n_ci == 1 else HW * tcout * 4
    return 2 * blocks + temps + scratch            # 2x for double-buffering


# ----------------------------------------------------------------------------
# Kernel 1: dilated 3x3 conv (no bias) as 9 shifted matmuls on the MXU.
# The 9 taps accumulate in a local value (one acc RMW per Cin step); the
# epilogue emits per-channel sum / sum-of-squares for fused BN statistics.
# ----------------------------------------------------------------------------
def _conv_kernel(x_ref, w_ref, out_ref, sum_ref, sumsq_ref, *acc_scratch,
                 H, W, dilation, n_ci):
    ci = pl.program_id(2)
    Hp = x_ref.shape[1]
    tcin = x_ref.shape[3]
    HW = H * W

    # --- 9 taps into a single local accumulation (one MXU chain) ---
    local = None
    for kx in range(3):
        x0 = kx * dilation
        # One (possibly misaligned) W-window load + reshape per kx (3 per step,
        # not 9); the ky taps below are whole-row slices of the flattened band
        # (sublane-aligned when W % 8 == 0).
        # TODO(synk): when W % 8 != 0 this reshape still costs a copy; padding
        #             W to a multiple of 8 with masked stats would remove it.
        band = x_ref[0, :, x0:x0 + W, :].reshape(Hp * W, tcin)
        for ky in range(3):
            r0 = ky * dilation * W
            contrib = jnp.dot(band[r0:r0 + HW], w_ref[ky, kx],
                              preferred_element_type=jnp.float32)
            local = contrib if local is None else local + contrib

    def _finalize(acc):
        out_ref[0] = acc.astype(out_ref.dtype)                     # lane-dense 2D store
        sum_ref[0] = jnp.sum(acc, axis=0, keepdims=True)           # (1, tcout) f32
        sumsq_ref[0] = jnp.sum(acc * acc, axis=0, keepdims=True)   # (1, tcout) f32

    if n_ci == 1:
        # Single Cin step: no cross-step accumulator needed at all.
        _finalize(local)
    else:
        acc_ref = acc_scratch[0]

        @pl.when(ci == 0)
        def _():
            acc_ref[...] = local

        @pl.when(jnp.logical_and(ci > 0, ci < n_ci - 1))
        def _():
            acc_ref[...] += local

        @pl.when(ci == n_ci - 1)
        def _():
            _finalize(acc_ref[...] + local)


# ----------------------------------------------------------------------------
# Kernel 2: tiled affine normalize (precomputed per-channel scale/shift)
# + LeakyReLU over NHWC blocks (Cout on the lane axis).
# ----------------------------------------------------------------------------
def _bn_act_kernel(y_ref, scale_ref, shift_ref, out_ref):
    z = y_ref[...].astype(jnp.float32) * scale_ref[...] + shift_ref[...]
    out_ref[...] = jnp.where(z >= 0, z, LEAKY_SLOPE * z).astype(out_ref.dtype)


def aspp_conv_forward(x_nchw, weight_oihw, gamma, beta, dilation,
                      compute_dtype=jnp.bfloat16):
    """Forward pass matching ASPPConv.forward (BatchNorm2d in training mode).

    x_nchw:      (N, Cin, H, W) float32
    weight_oihw: (Cout, Cin, 3, 3) float32  (PyTorch conv weight layout)
    gamma, beta: (Cout,) float32
    returns:     (N, Cout, H, W) float32
    """
    N, Cin, H, W = map(int, x_nchw.shape)
    Cout = int(weight_oihw.shape[0])
    d = int(dilation)
    Hp, Wp = H + 2 * d, W + 2 * d
    HW = H * W
    M = N * HW

    comp_isz = jnp.dtype(compute_dtype).itemsize
    inter_dtype = compute_dtype            # conv intermediate; BN stats stay f32
    inter_isz = jnp.dtype(inter_dtype).itemsize
    cap = _vmem_cap_bytes()

    # Prefer a single full-Cout tile (no re-streaming of the input per Cout
    # tile) whenever the f32 accumulator is modest; else tile Cout.
    tcout = Cout if HW * Cout * 4 <= (8 << 20) else _channel_tile(Cout)
    # 256-wide Cin tile for the 256x256 MXUs where the VMEM budget allows,
    # else fall back to 128 / full Cin.
    cands = [t for t in (256, 128) if Cin % t == 0] or [Cin]
    tcin = cands[-1]
    conv_need = _conv_vmem_need(Hp, Wp, HW, W, tcin, tcout, comp_isz, inter_isz,
                                Cin // tcin)
    for t in cands:
        need = _conv_vmem_need(Hp, Wp, HW, W, t, tcout, comp_isz, inter_isz,
                               Cin // t)
        if need * 3 // 2 + (4 << 20) <= cap - (8 << 20):
            tcin, conv_need = t, need
            break
    n_ci = Cin // tcin
    n_co = Cout // tcout

    # ---- glue: NCHW -> NHWC + halo padding (padding == dilation) ----
    # TODO(synk): the padded HBM copy amplifies input reads at large dilation;
    #             in-kernel masked boundary taps would avoid it.
    x_nhwc = jnp.transpose(x_nchw, (0, 2, 3, 1)).astype(compute_dtype)
    x_pad = jnp.pad(x_nhwc, ((0, 0), (d, d), (d, d), (0, 0)))       # (N, Hp, Wp, Cin)
    w_hwio = jnp.transpose(weight_oihw, (2, 3, 1, 0)).astype(compute_dtype)

    conv_cost = pl.CostEstimate(
        flops=2 * N * HW * 9 * Cin * Cout,
        transcendentals=0,
        bytes_accessed=(N * Hp * Wp * Cin * comp_isz * n_co
                        + 9 * Cin * Cout * comp_isz
                        + N * HW * Cout * inter_isz + 2 * N * Cout * 4))

    scratch_shapes = [] if n_ci == 1 else [pltpu.VMEM((HW, tcout), jnp.float32)]

    conv_out, ch_sum_p, ch_sumsq_p = pl.pallas_call(
        functools.partial(_conv_kernel, H=H, W=W, dilation=d, n_ci=n_ci),
        out_shape=(jax.ShapeDtypeStruct((N, HW, Cout), inter_dtype),
                   jax.ShapeDtypeStruct((N, 1, Cout), jnp.float32),
                   jax.ShapeDtypeStruct((N, 1, Cout), jnp.float32)),
        grid_spec=pltpu.PrefetchScalarGridSpec(
            num_scalar_prefetch=0,
            grid=(N, n_co, n_ci),
            in_specs=[
                pl.BlockSpec((1, Hp, Wp, tcin), lambda n, co, ci: (n, 0, 0, ci)),
                pl.BlockSpec((3, 3, tcin, tcout), lambda n, co, ci: (0, 0, ci, co)),
            ],
            out_specs=[
                pl.BlockSpec((1, HW, tcout), lambda n, co, ci: (n, 0, co)),
                pl.BlockSpec((1, 1, tcout), lambda n, co, ci: (n, 0, co)),
                pl.BlockSpec((1, 1, tcout), lambda n, co, ci: (n, 0, co)),
            ],
            scratch_shapes=scratch_shapes),
        compiler_params=pltpu.CompilerParams(
            dimension_semantics=("parallel", "parallel", "arbitrary"),
            vmem_limit_bytes=_clamp_vmem_limit(conv_need, cap)),
        cost_estimate=conv_cost,
    )(x_pad, w_hwio)

    # ---- finish BatchNorm training-mode batch statistics (tiny XLA math) ----
    # TODO(synk): running_mean / running_var of a stateful nn.BatchNorm2d are
    #             not tracked; only the training-mode forward output is produced.
    count = jnp.float32(M)
    ch_sum = jnp.sum(ch_sum_p[:, 0, :], axis=0)                   # (Cout,)
    ch_sumsq = jnp.sum(ch_sumsq_p[:, 0, :], axis=0)               # (Cout,)
    mean = ch_sum / count
    # TODO(synk): single-pass E[x^2]-E[x]^2 in f32 can lose precision for
    #             large-magnitude activations relative to a two-pass variance.
    var = jnp.maximum(ch_sumsq / count - mean * mean, 0.0)        # biased batch var
    inv = jax.lax.rsqrt(var + BN_EPS)
    g32 = gamma.astype(jnp.float32)
    scale = (g32 * inv).reshape(1, Cout)
    shift = (beta.astype(jnp.float32) - mean * g32 * inv).reshape(1, Cout)

    # ---- tiled normalize + LeakyReLU over (1, th, W, tcout) NHWC blocks ----
    y_nhwc = conv_out.reshape(N, H, W, Cout)                      # free metadata reshape
    tco_bn = _channel_tile(Cout)
    th = _divisor_tile(H, max(1, (1 << 20) // max(1, W * tco_bn * 4)))
    bn_blk = th * W * tco_bn * (inter_isz + 4) + 2 * tco_bn * 4
    bn_cost = pl.CostEstimate(flops=4 * M * Cout, transcendentals=0,
                              bytes_accessed=M * Cout * (inter_isz + 4) + 2 * Cout * 4)
    bn_out = pl.pallas_call(
        _bn_act_kernel,
        out_shape=jax.ShapeDtypeStruct((N, H, W, Cout), jnp.float32),
        grid_spec=pltpu.PrefetchScalarGridSpec(
            num_scalar_prefetch=0,
            grid=(N, H // th, Cout // tco_bn),
            in_specs=[
                pl.BlockSpec((1, th, W, tco_bn), lambda n, h, c: (n, h, 0, c)),
                pl.BlockSpec((1, tco_bn), lambda n, h, c: (0, c)),
                pl.BlockSpec((1, tco_bn), lambda n, h, c: (0, c)),
            ],
            out_specs=pl.BlockSpec((1, th, W, tco_bn), lambda n, h, c: (n, h, 0, c))),
        compiler_params=pltpu.CompilerParams(
            dimension_semantics=("parallel", "parallel", "parallel"),
            vmem_limit_bytes=_clamp_vmem_limit(2 * bn_blk, cap)),
        cost_estimate=bn_cost,
    )(y_nhwc, scale, shift)

    # TODO(synk): keep NHWC end-to-end (drop both transposes) if the ASPP
    #             consumer can concatenate channels in NHWC.
    return jnp.transpose(bn_out, (0, 3, 1, 2))                    # NCHW


def _reference(x, weight, gamma, beta, d):
    """Pure-JAX f32 reference matching the PyTorch module's forward."""
    conv = jax.lax.conv_general_dilated(
        x, weight, window_strides=(1, 1), padding=((d, d), (d, d)),
        rhs_dilation=(d, d), dimension_numbers=('NCHW', 'OIHW', 'NCHW'),
        precision=jax.lax.Precision.HIGHEST)
    mean = conv.mean(axis=(0, 2, 3), keepdims=True)
    var = ((conv - mean) ** 2).mean(axis=(0, 2, 3), keepdims=True)
    z = (conv - mean) * jax.lax.rsqrt(var + BN_EPS)
    z = z * gamma[None, :, None, None] + beta[None, :, None, None]
    return jnp.where(z >= 0, z, LEAKY_SLOPE * z)


if __name__ == "__main__":
    # Small deterministic problem: ASPPConv(in_channels=4, out_channels=8, dilation=2)
    N, Cin, H, W = 2, 4, 16, 16
    Cout, dilation = 8, 2

    key = jax.random.PRNGKey(0)
    kx, kw, kg, kb = jax.random.split(key, 4)
    x = jax.random.normal(kx, (N, Cin, H, W), dtype=jnp.float32)
    weight = jax.random.normal(kw, (Cout, Cin, 3, 3), dtype=jnp.float32) * 0.1
    gamma = 1.0 + 0.1 * jax.random.normal(kg, (Cout,), dtype=jnp.float32)
    beta = 0.1 * jax.random.normal(kb, (Cout,), dtype=jnp.float32)

    ref = _reference(x, weight, gamma, beta, dilation)

    out_f32 = aspp_conv_forward(x, weight, gamma, beta, dilation,
                                compute_dtype=jnp.float32)
    out_bf16 = aspp_conv_forward(x, weight, gamma, beta, dilation)  # bf16 matmul + bf16 intermediate
    jax.block_until_ready((out_f32, out_bf16))

    assert out_f32.shape == (N, Cout, H, W)
    assert out_bf16.shape == (N, Cout, H, W)
    assert float(jnp.max(jnp.abs(out_f32 - ref))) < 2e-3
    assert float(jnp.max(jnp.abs(out_bf16 - ref))) < 1e-1
    print("KERNEL_OK")
</pallas_src>

<mosaic_0001>
module attributes {stable_mosaic.version = 11 : i64} {
  func.func @_conv_kernel(%arg0: i32, %arg1: i32, %arg2: i32, %arg3: memref<1x20x20x4xf32, #tpu.memory_space<vmem>>, %arg4: memref<3x3x4x8xf32, #tpu.memory_space<vmem>>, %arg5: memref<1x256x8xf32, #tpu.memory_space<vmem>>, %arg6: memref<1x1x8xf32, #tpu.memory_space<vmem>>, %arg7: memref<1x1x8xf32, #tpu.memory_space<vmem>>) attributes {dimension_semantics = [#tpu.dimension_semantics<parallel>, #tpu.dimension_semantics<parallel>, #tpu.dimension_semantics<arbitrary>], iteration_bounds = array<i64: 2, 1, 1>, scalar_prefetch = 0 : i64, scratch_operands = 0 : i64, tpu.core_type = #tpu.core_type<tc>, window_params = [{transform_indices = @transform_0, window_bounds = array<i64: 1, 20, 20, 4>}, {transform_indices = @transform_1, window_bounds = array<i64: 3, 3, 4, 8>}, {transform_indices = @transform_2, window_bounds = array<i64: 1, 256, 8>}, {transform_indices = @transform_3, window_bounds = array<i64: 1, 1, 8>}, {transform_indices = @transform_4, window_bounds = array<i64: 1, 1, 8>}]} {
    %c0 = arith.constant 0 : index
    %c0_0 = arith.constant 0 : index
    %c0_1 = arith.constant 0 : index
    %c0_2 = arith.constant 0 : index
    %0 = vector.load %arg3[%c0, %c0_0, %c0_1, %c0_2] : memref<1x20x20x4xf32, #tpu.memory_space<vmem>>, vector<1x20x16x4xf32>
    %1 = vector.shape_cast %0 : vector<1x20x16x4xf32> to vector<20x16x4xf32>
    %2 = vector.shape_cast %1 : vector<20x16x4xf32> to vector<320x4xf32>
    %3 = vector.extract_strided_slice %2 {offsets = [0, 0], sizes = [256, 4], strides = [1, 1]} : vector<320x4xf32> to vector<256x4xf32>
    %c0_3 = arith.constant 0 : index
    %c0_4 = arith.constant 0 : index
    %c0_5 = arith.constant 0 : index
    %c0_6 = arith.constant 0 : index
    %4 = vector.load %arg4[%c0_3, %c0_4, %c0_5, %c0_6] : memref<3x3x4x8xf32, #tpu.memory_space<vmem>>, vector<1x1x4x8xf32>
    %5 = vector.shape_cast %4 : vector<1x1x4x8xf32> to vector<4x8xf32>
    %cst = arith.constant dense<0.000000e+00> : vector<256x8xf32>
    %6 = tpu.matmul %3, %5, %cst {dimension_numbers = #tpu.dot_dimension_numbers<[1], [0], [0], [1], [0, 0, 1, 1], [], []>} : vector<256x4xf32>, vector<4x8xf32>, vector<256x8xf32> -> vector<256x8xf32>
    %7 = vector.extract_strided_slice %2 {offsets = [32, 0], sizes = [256, 4], strides = [1, 1]} : vector<320x4xf32> to vector<256x4xf32>
    %c1 = arith.constant 1 : index
    %c0_7 = arith.constant 0 : index
    %c0_8 = arith.constant 0 : index
    %c0_9 = arith.constant 0 : index
    %8 = vector.load %arg4[%c1, %c0_7, %c0_8, %c0_9] : memref<3x3x4x8xf32, #tpu.memory_space<vmem>>, vector<1x1x4x8xf32>
    %9 = vector.shape_cast %8 : vector<1x1x4x8xf32> to vector<4x8xf32>
    %cst_10 = arith.constant dense<0.000000e+00> : vector<256x8xf32>
    %10 = tpu.matmul %7, %9, %cst_10 {dimension_numbers = #tpu.dot_dimension_numbers<[1], [0], [0], [1], [0, 0, 1, 1], [], []>} : vector<256x4xf32>, vector<4x8xf32>, vector<256x8xf32> -> vector<256x8xf32>
    %11 = arith.addf %6, %10 : vector<256x8xf32>
    %12 = vector.extract_strided_slice %2 {offsets = [64, 0], sizes = [256, 4], strides = [1, 1]} : vector<320x4xf32> to vector<256x4xf32>
    %c2 = arith.constant 2 : index
    %c0_11 = arith.constant 0 : index
    %c0_12 = arith.constant 0 : index
    %c0_13 = arith.constant 0 : index
    %13 = vector.load %arg4[%c2, %c0_11, %c0_12, %c0_13] : memref<3x3x4x8xf32, #tpu.memory_space<vmem>>, vector<1x1x4x8xf32>
    %14 = vector.shape_cast %13 : vector<1x1x4x8xf32> to vector<4x8xf32>
    %cst_14 = arith.constant dense<0.000000e+00> : vector<256x8xf32>
    %15 = tpu.matmul %12, %14, %cst_14 {dimension_numbers = #tpu.dot_dimension_numbers<[1], [0], [0], [1], [0, 0, 1, 1], [], []>} : vector<256x4xf32>, vector<4x8xf32>, vector<256x8xf32> -> vector<256x8xf32>
    %16 = arith.addf %11, %15 : vector<256x8xf32>
    %c0_15 = arith.constant 0 : index
    %c0_16 = arith.constant 0 : index
    %c2_17 = arith.constant 2 : index
    %c0_18 = arith.constant 0 : index
    %17 = vector.load %arg3[%c0_15, %c0_16, %c2_17, %c0_18] : memref<1x20x20x4xf32, #tpu.memory_space<vmem>>, vector<1x20x16x4xf32>
    %18 = vector.shape_cast %17 : vector<1x20x16x4xf32> to vector<20x16x4xf32>
    %19 = vector.shape_cast %18 : vector<20x16x4xf32> to vector<320x4xf32>
    %20 = vector.extract_strided_slice %19 {offsets = [0, 0], sizes = [256, 4], strides = [1, 1]} : vector<320x4xf32> to vector<256x4xf32>
    %c0_19 = arith.constant 0 : index
    %c1_20 = arith.constant 1 : index
    %c0_21 = arith.constant 0 : index
    %c0_22 = arith.constant 0 : index
    %21 = vector.load %arg4[%c0_19, %c1_20, %c0_21, %c0_22] : memref<3x3x4x8xf32, #tpu.memory_space<vmem>>, vector<1x1x4x8xf32>
    %22 = vector.shape_cast %21 : vector<1x1x4x8xf32> to vector<4x8xf32>
    %cst_23 = arith.constant dense<0.000000e+00> : vector<256x8xf32>
    %23 = tpu.matmul %20, %22, %cst_23 {dimension_numbers = #tpu.dot_dimension_numbers<[1], [0], [0], [1], [0, 0, 1, 1], [], []>} : vector<256x4xf32>, vector<4x8xf32>, vector<256x8xf32> -> vector<256x8xf32>
    %24 = arith.addf %16, %23 : vector<256x8xf32>
    %25 = vector.extract_strided_slice %19 {offsets = [32, 0], sizes = [256, 4], strides = [1, 1]} : vector<320x4xf32> to vector<256x4xf32>
    %c1_24 = arith.constant 1 : index
    %c1_25 = arith.constant 1 : index
    %c0_26 = arith.constant 0 : index
    %c0_27 = arith.constant 0 : index
    %26 = vector.load %arg4[%c1_24, %c1_25, %c0_26, %c0_27] : memref<3x3x4x8xf32, #tpu.memory_space<vmem>>, vector<1x1x4x8xf32>
    %27 = vector.shape_cast %26 : vector<1x1x4x8xf32> to vector<4x8xf32>
    %cst_28 = arith.constant dense<0.000000e+00> : vector<256x8xf32>
    %28 = tpu.matmul %25, %27, %cst_28 {dimension_numbers = #tpu.dot_dimension_numbers<[1], [0], [0], [1], [0, 0, 1, 1], [], []>} : vector<256x4xf32>, vector<4x8xf32>, vector<256x8xf32> -> vector<256x8xf32>
    %29 = arith.addf %24, %28 : vector<256x8xf32>
    %30 = vector.extract_strided_slice %19 {offsets = [64, 0], sizes = [256, 4], strides = [1, 1]} : vector<320x4xf32> to vector<256x4xf32>
    %c2_29 = arith.constant 2 : index
    %c1_30 = arith.constant 1 : index
    %c0_31 = arith.constant 0 : index
    %c0_32 = arith.constant 0 : index
    %31 = vector.load %arg4[%c2_29, %c1_30, %c0_31, %c0_32] : memref<3x3x4x8xf32, #tpu.memory_space<vmem>>, vector<1x1x4x8xf32>
    %32 = vector.shape_cast %31 : vector<1x1x4x8xf32> to vector<4x8xf32>
    %cst_33 = arith.constant dense<0.000000e+00> : vector<256x8xf32>
    %33 = tpu.matmul %30, %32, %cst_33 {dimension_numbers = #tpu.dot_dimension_numbers<[1], [0], [0], [1], [0, 0, 1, 1], [], []>} : vector<256x4xf32>, vector<4x8xf32>, vector<256x8xf32> -> vector<256x8xf32>
    %34 = arith.addf %29, %33 : vector<256x8xf32>
    %c0_34 = arith.constant 0 : index
    %c0_35 = arith.constant 0 : index
    %c4 = arith.constant 4 : index
    %c0_36 = arith.constant 0 : index
    %35 = vector.load %arg3[%c0_34, %c0_35, %c4, %c0_36] : memref<1x20x20x4xf32, #tpu.memory_space<vmem>>, vector<1x20x16x4xf32>
    %36 = vector.shape_cast %35 : vector<1x20x16x4xf32> to vector<20x16x4xf32>
    %37 = vector.shape_cast %36 : vector<20x16x4xf32> to vector<320x4xf32>
    %38 = vector.extract_strided_slice %37 {offsets = [0, 0], sizes = [256, 4], strides = [1, 1]} : vector<320x4xf32> to vector<256x4xf32>
    %c0_37 = arith.constant 0 : index
    %c2_38 = arith.constant 2 : index
    %c0_39 = arith.constant 0 : index
    %c0_40 = arith.constant 0 : index
    %39 = vector.load %arg4[%c0_37, %c2_38, %c0_39, %c0_40] : memref<3x3x4x8xf32, #tpu.memory_space<vmem>>, vector<1x1x4x8xf32>
    %40 = vector.shape_cast %39 : vector<1x1x4x8xf32> to vector<4x8xf32>
    %cst_41 = arith.constant dense<0.000000e+00> : vector<256x8xf32>
    %41 = tpu.matmul %38, %40, %cst_41 {dimension_numbers = #tpu.dot_dimension_numbers<[1], [0], [0], [1], [0, 0, 1, 1], [], []>} : vector<256x4xf32>, vector<4x8xf32>, vector<256x8xf32> -> vector<256x8xf32>
    %42 = arith.addf %34, %41 : vector<256x8xf32>
    %43 = vector.extract_strided_slice %37 {offsets = [32, 0], sizes = [256, 4], strides = [1, 1]} : vector<320x4xf32> to vector<256x4xf32>
    %c1_42 = arith.constant 1 : index
    %c2_43 = arith.constant 2 : index
    %c0_44 = arith.constant 0 : index
    %c0_45 = arith.constant 0 : index
    %44 = vector.load %arg4[%c1_42, %c2_43, %c0_44, %c0_45] : memref<3x3x4x8xf32, #tpu.memory_space<vmem>>, vector<1x1x4x8xf32>
    %45 = vector.shape_cast %44 : vector<1x1x4x8xf32> to vector<4x8xf32>
    %cst_46 = arith.constant dense<0.000000e+00> : vector<256x8xf32>
    %46 = tpu.matmul %43, %45, %cst_46 {dimension_numbers = #tpu.dot_dimension_numbers<[1], [0], [0], [1], [0, 0, 1, 1], [], []>} : vector<256x4xf32>, vector<4x8xf32>, vector<256x8xf32> -> vector<256x8xf32>
    %47 = arith.addf %42, %46 : vector<256x8xf32>
    %48 = vector.extract_strided_slice %37 {offsets = [64, 0], sizes = [256, 4], strides = [1, 1]} : vector<320x4xf32> to vector<256x4xf32>
    %c2_47 = arith.constant 2 : index
    %c2_48 = arith.constant 2 : index
    %c0_49 = arith.constant 0 : index
    %c0_50 = arith.constant 0 : index
    %49 = vector.load %arg4[%c2_47, %c2_48, %c0_49, %c0_50] : memref<3x3x4x8xf32, #tpu.memory_space<vmem>>, vector<1x1x4x8xf32>
    %50 = vector.shape_cast %49 : vector<1x1x4x8xf32> to vector<4x8xf32>
    %cst_51 = arith.constant dense<0.000000e+00> : vector<256x8xf32>
    %51 = tpu.matmul %48, %50, %cst_51 {dimension_numbers = #tpu.dot_dimension_numbers<[1], [0], [0], [1], [0, 0, 1, 1], [], []>} : vector<256x4xf32>, vector<4x8xf32>, vector<256x8xf32> -> vector<256x8xf32>
    %52 = arith.addf %47, %51 : vector<256x8xf32>
    %c0_52 = arith.constant 0 : index
    %c0_53 = arith.constant 0 : index
    %c0_54 = arith.constant 0 : index
    %53 = vector.load %arg5[%c0_52, %c0_53, %c0_54] : memref<1x256x8xf32, #tpu.memory_space<vmem>>, vector<1x256x8xf32>
    %54 = vector.shape_cast %53 : vector<1x256x8xf32> to vector<256x8xf32>
    %55 = vector.shape_cast %52 : vector<256x8xf32> to vector<1x256x8xf32>
    tpu.vector_store %arg5[%c0_52, %c0_53, %c0_54], %55 {strides = array<i32>} : memref<1x256x8xf32, #tpu.memory_space<vmem>>, vector<1x256x8xf32>,
    %cst_55 = arith.constant dense<0.000000e+00> : vector<8xf32>
    %56 = vector.multi_reduction <add>, %52, %cst_55 [0] : vector<256x8xf32> to vector<8xf32>
    %57 = vector.shape_cast %56 : vector<8xf32> to vector<1x8xf32>
    %c0_56 = arith.constant 0 : index
    %c0_57 = arith.constant 0 : index
    %c0_58 = arith.constant 0 : index
    %58 = vector.load %arg6[%c0_56, %c0_57, %c0_58] : memref<1x1x8xf32, #tpu.memory_space<vmem>>, vector<1x1x8xf32>
    %59 = vector.shape_cast %58 : vector<1x1x8xf32> to vector<1x8xf32>
    %60 = vector.shape_cast %57 : vector<1x8xf32> to vector<1x1x8xf32>
    tpu.vector_store %arg6[%c0_56, %c0_57, %c0_58], %60 {strides = array<i32>} : memref<1x1x8xf32, #tpu.memory_space<vmem>>, vector<1x1x8xf32>,
    %61 = arith.mulf %52, %52 : vector<256x8xf32>
    %cst_59 = arith.constant dense<0.000000e+00> : vector<8xf32>
    %62 = vector.multi_reduction <add>, %61, %cst_59 [0] : vector<256x8xf32> to vector<8xf32>
    %63 = vector.shape_cast %62 : vector<8xf32> to vector<1x8xf32>
    %c0_60 = arith.constant 0 : index
    %c0_61 = arith.constant 0 : index
    %c0_62 = arith.constant 0 : index
    %64 = vector.load %arg7[%c0_60, %c0_61, %c0_62] : memref<1x1x8xf32, #tpu.memory_space<vmem>>, vector<1x1x8xf32>
    %65 = vector.shape_cast %64 : vector<1x1x8xf32> to vector<1x8xf32>
    %66 = vector.shape_cast %63 : vector<1x8xf32> to vector<1x1x8xf32>
    tpu.vector_store %arg7[%c0_60, %c0_61, %c0_62], %66 {strides = array<i32>} : memref<1x1x8xf32, #tpu.memory_space<vmem>>, vector<1x1x8xf32>,
    return
  }
  func.func @transform_0(%arg0: i32, %arg1: i32, %arg2: i32) -> (i32, i32, i32, i32) {
    %c0_i32 = arith.constant 0 : i32
    %c0_i32_0 = arith.constant 0 : i32
    %c0_i32_1 = arith.constant 0 : i32
    return %arg0, %c0_i32, %c0_i32_0, %arg2 : i32, i32, i32, i32
  }
  func.func @transform_1(%arg0: i32, %arg1: i32, %arg2: i32) -> (i32, i32, i32, i32) {
    %c0_i32 = arith.constant 0 : i32
    %c0_i32_0 = arith.constant 0 : i32
    %c0_i32_1 = arith.constant 0 : i32
    return %c0_i32, %c0_i32_0, %arg2, %arg1 : i32, i32, i32, i32
  }
  func.func @transform_2(%arg0: i32, %arg1: i32, %arg2: i32) -> (i32, i32, i32) {
    %c0_i32 = arith.constant 0 : i32
    %c0_i32_0 = arith.constant 0 : i32
    return %arg0, %c0_i32, %arg1 : i32, i32, i32
  }
  func.func @transform_3(%arg0: i32, %arg1: i32, %arg2: i32) -> (i32, i32, i32) {
    %c0_i32 = arith.constant 0 : i32
    %c0_i32_0 = arith.constant 0 : i32
    return %arg0, %c0_i32, %arg1 : i32, i32, i32
  }
  func.func @transform_4(%arg0: i32, %arg1: i32, %arg2: i32) -> (i32, i32, i32) {
    %c0_i32 = arith.constant 0 : i32
    %c0_i32_0 = arith.constant 0 : i32
    return %arg0, %c0_i32, %arg1 : i32, i32, i32
  }
}

</mosaic_0001>

<bundles_post_ra>
// kernel: tpu_custom_call.1
= control target key start
LH: loop header
LB: loop body
LE: loop exit
PB: predicated region body
PF: predicated region fallthrough
CT: control target
= control target key end

     0   :  { %10 = vsyncpa [#allocation3], 0  ;;  %s4320_s0 = inlined_call_operand.vmem [shape: f32[2,20,20,4], index: 0, kind: input, shape index: {}]   ;;  %s4321_s1 = inlined_call_operand.vmem [shape: f32[3,3,4,8], index: 1, kind: input, shape index: {}]   ;;  %s4322_s2 = inlined_call_operand.vmem [shape: f32[2,256,8], index: 2, kind: output, shape index: {0}]   ;;  %s4323_s3 = inlined_call_operand.hbm [shape: f32[2,1,8], index: 3, kind: output, shape index: {1}]   ;;  %s4324_s4 = inlined_call_operand.hbm [shape: f32[2,1,8], index: 4, kind: output, shape index: {2}]  }
   0x1   :  { %12 = vsyncpa [#allocation3 + $0x1], 0 }
   0x2   :  { %13 = vsyncpa [#allocation5], 0 }
   0x3   :  { %15 = vsyncpa [#allocation5 + $0x1], 0  ;;  %s2977_s15 = smov 0   ;;  %s2979_s16 = smov 0  }
   0x4   :  { %s2981_s17 = smov 0   ;;  %s2983_s18 = smov 0  }
   0x5   :  { %s2985_s19 = smov 0   ;;  %s2987_s20 = smov 0  }
   0x6 LB: > { %s2459_s21 = sadd.s32 4294967295, %s2950_s20   ;;  %s2460_s22 = sadd.s32 4294967294, %s2950_s20   ;;  %s2950_s20 = sphi %s2987_s20, %s21_s20   ;;  %s2946_s19 = sphi %s2985_s19, %s4358_s19   ;;  %s2942_s18 = sphi %s2983_s18, %s4357_s18   ;;  %s2938_s17 = sphi %s2981_s17, %s4356_s17   ;;  %s2934_s16 = sphi %s2979_s16, %s4355_s16   ;;  %s2930_s15 = sphi %s2977_s15, %s4354_s15  }
   0x7   : > { %s40_s23 = sadd.s32 1, %s2946_s19  ;;  %s133_s24 = sadd.s32 1, %s2938_s17 }
   0x8   : > { %p42_p0 = scmp.ge.s32.totalorder %s40_s23, 2  ;;  %p143_p1 = scmp.ne.s32.totalorder %s2938_s17, %s2934_s16 }
   0x9   : > { %p144_p2 = scmp.eq.s32.totalorder %s2459_s21, 1  ;;  %p149_p3 = scmp.ne.s32.totalorder %s2934_s16, %s2930_s15 }
   0xa   : > { %s4360_s23 = smov (%p42_p0, %s40_s23), 0  ;;  %p150_p5 = scmp.eq.s32.totalorder %s2460_s22, 1 }
   0xb   : > { %p3017_p4 = por %p144_p2, %p143_p1  ;;  %s128_s26 = ssub.s32 %s2946_s19, %s4360_s23 }
   0xc   : > { %p2464_p6 = scmp.ge.s32.totalorder %s2950_s20, 1  ;;  %p131_p7 = scmp.eq.s32.totalorder %s128_s26, 0 }
   0xd   : > { %p3024_p8 = por %p150_p5, %p149_p3  ;;  %p217_p9 = scmp.lt.s32.totalorder %s2950_s20, 3 }
   0xe   : > { %s3030_s28 = scalar_select %p131_p7, %s2938_s17, %s133_s24  }
   0xf   : > { %p218_p10 = pnand %p2464_p6, %p217_p9 }
  0x11   : > { %221 = sbr.rel (%p218_p10) target bundleno = 767 (0x2ff), region = 28 }
  0x16   : > { %v2468_v0 = vld [vmem:[%s4321_s1 + $0xc] sm:$0xf]  ;;  %vm427_vm0 = vcmask 1043456   ;;  %p264_p11 = scmp.lt.s32.totalorder %s2942_s18, 1  ;;  %v2535_v1 = vld [vmem:[%s4321_s1 + $0x18] sm:$0xf]  ;;  %s2299_s30 = scalar_lea.hbm %s4324_s4, %s2942_s18 }
  0x17   : > { %2776 = vmatpush.msk.msra.mxu1 %vm427_vm0, %v2468_v0  ;;  %2777 = vmatpush.msk.msra.mxu2 %vm427_vm0, %v2468_v0  ;;  %v2569_v2 = vld [vmem:[%s4321_s1 + $0x4] sm:$0xf]  ;;  %v327_v3 = vld [vmem:[%s4321_s1] sm:$0xf]  ;;  %v2603_v4 = vld [vmem:[%s4321_s1 + $0x10] sm:$0xf] }
  0x18   : > { %s3048_s11 = scalar_select %p264_p11, %s2942_s18, 1  ;;  %2778 = vmatpush.msk.msra.mxu3 %vm427_vm0, %v2468_v0  ;;  %2469 = vmatpush.msk.msra.mxu0 %vm427_vm0, %v2468_v0  ;;  %vm330_vm1 = vcmask 31744   ;;  %v2671_v25 = vld [vmem:[%s4321_s1 + $0x8] sm:$0xf]  ;;  %v2705_v26 = vld [vmem:[%s4321_s1 + $0x14] sm:$0xf] }
  0x19   : > { %2536 = vmatpush.msk.msrb.mxu2 %vm427_vm0, %v2535_v1  ;;  %2502 = vmatpush.msk.msrb.mxu1 %vm427_vm0, %v327_v3  ;;  %v2637_v27 = vld [vmem:[%s4321_s1 + $0x1c] sm:$0xf]  ;;  %v2739_v32 = vld [vmem:[%s4321_s1 + $0x20] sm:$0xf]  ;;  %vm2054_vm2 = vcmask 64512   ;;  %vm2156_vm3 = vcmask 57344  }
  0x1a   : > { %2570 = vmatpush.msk.msrb.mxu3 %vm427_vm0, %v2569_v2  ;;  %s2779_s14 = smul.u32 480, %s3048_s11  ;;  %2604 = vmatpush.msk.msrb.mxu0 %vm427_vm0, %v2603_v4  ;;  %s2775_s10 = sshll.u32 %s3048_s11, 8 }
  0x1b   : > { %s4244_s11 = sand.u32 1, %s2934_s16   ;;  %s2860_s22 = scalar_lea.hbm %s4323_s3, 2 }
  0x1c   : > { %s3063_s24 = scalar_lea.vmem %s4320_s0, %s2779_s14  ;;  %s3932_s14 = scalar_lea.vmem %s4322_s2, %s2775_s10 }
  0x1d   : > { %v3066_v5 = vld [vmem:[%s3063_s24 + $0x90] sm:$0xff]  ;;  %v3086_v9 = vld [vmem:[%s3063_s24 + $0x98] sm:$0xff]  ;;  %v3106_v13 = vld [vmem:[%s3063_s24 + $0xa8] sm:$0xff]  ;;  %s257_s5 = scalar_lea.vmem [#allocation2], %s4244_s11  ;;  %s263_s8 = scalar_lea.vmem [#allocation4], %s4244_s11 }
  0x1e   : > { %v3069_v6 = vld [vmem:[%s3063_s24 + $0xf0] sm:$0xff]  ;;  %2478 = vmatmul.msk.f32.vlgmr.msra.gmra.mxu1 %vm330_vm1, %v3066_v5  ;;  %v3089_v10 = vld [vmem:[%s3063_s24 + $0xf8] sm:$0xff]  ;;  %v3109_v14 = vld [vmem:[%s3063_s24 + $0x108] sm:$0xff]  ;;  %s4255_s6 = sshll.u32 %s257_s5, 4  ;;  %s4260_s9 = sshll.u32 %s263_s8, 4  ;;  %s2288_s6 = int_to_ptr.vmem [resolvable:$true] %s4255_s6  ;;  %s2302_s9 = int_to_ptr.vmem [resolvable:$true] %s4260_s9 }
  0x1f   : > { %v3072_v7 = vld [vmem:[%s3063_s24 + $0x150] sm:$0xff]  ;;  %2486 = vmatmul.msk.f32.vlgmr.msra.gmra.mxu2 %vm330_vm1, %v3069_v6  ;;  %v3092_v11 = vld [vmem:[%s3063_s24 + $0x158] sm:$0xff]  ;;  %v3112_v15 = vld [vmem:[%s3063_s24 + $0x168] sm:$0xff]  ;;  %2638 = vmatpush.msk.msra.mxu1 %vm427_vm0, %v2637_v27  ;;  %s4262_s10 = sshll.u32 %s2299_s30, 4  ;;  %s2304_s10 = int_to_ptr.hbm [resolvable:$true] %s4262_s10 }
  0x20   : > { %v3079_v8 = vld [vmem:[%s3063_s24 + $0x30] sm:$0xff]  ;;  %2494 = vmatmul.msk.f32.vlgmr.msra.gmra.mxu3 %vm330_vm1, %v3072_v7  ;;  %v3095_v12 = vld [vmem:[%s3063_s24 + $0x38] sm:$0xff]  ;;  %v3115_v16 = vld [vmem:[%s3063_s24 + $0x48] sm:$0xff]  ;;  %2672 = vmatpush.msk.msra.mxu2 %vm427_vm0, %v2671_v25 }
  0x21   : > { %2470 = vmatmul.msk.f32.vlgmr.msra.gmra.mxu0 %vm330_vm1, %v3079_v8  ;;  %v3126_v17 = vld [vmem:[%s3063_s24 + $0xb0] sm:$0xff]  ;;  %v3146_v21 = vld [vmem:[%s3063_s24 + $0xc0] sm:$0xff]  ;;  %2706 = vmatpush.msk.msra.mxu3 %vm427_vm0, %v2705_v26  ;;  %v3178_v28 = vld [vmem:[%s3063_s24 + $0xc8] sm:$0xff] }
  0x22   : > { %v3129_v18 = vld [vmem:[%s3063_s24 + $0x110] sm:$0xff]  ;;  %v3149_v22 = vld [vmem:[%s3063_s24 + $0x120] sm:$0xff]  ;;  %v3181_v29 = vld [vmem:[%s3063_s24 + $0x128] sm:$0xff]  ;;  %2740 = vmatpush.msk.msra.mxu0 %vm427_vm0, %v2739_v32 }
  0x23   : > { %v3132_v19 = vld [vmem:[%s3063_s24 + $0x170] sm:$0xff]  ;;  %v3152_v23 = vld [vmem:[%s3063_s24 + $0x180] sm:$0xff]  ;;  %v3184_v30 = vld [vmem:[%s3063_s24 + $0x188] sm:$0xff] }
  0x24   : > { %v3135_v20 = vld [vmem:[%s3063_s24 + $0x50] sm:$0xff]  ;;  %v3155_v24 = vld [vmem:[%s3063_s24 + $0x60] sm:$0xff]  ;;  %v3187_v31 = vld [vmem:[%s3063_s24 + $0x68] sm:$0xff] }
  0x25   : > { %v3202_v33 = vld [vmem:[%s3063_s24 + $0xd8] sm:$0xff]  ;;  %v3222_v37 = vld [vmem:[%s3063_s24 + $0xe0] sm:$0xff]  ;;  %v288_v44 = vld [vmem:[%s3063_s24 + $0x8] sm:$0xff] }
  0x26   : > { %2479 = vmatmul.msk.f32.gmra.mxu1 %vm330_vm1, %v3086_v9  ;;  %v3205_v34 = vld [vmem:[%s3063_s24 + $0x138] sm:$0xff]  ;;  %v3225_v38 = vld [vmem:[%s3063_s24 + $0x140] sm:$0xff]  ;;  %v835_v45 = vld [vmem:[%s3063_s24 + $0xa] sm:$0xff] }
  0x27   : > { %2487 = vmatmul.msk.f32.gmra.mxu2 %vm330_vm1, %v3089_v10  ;;  %v3208_v35 = vld [vmem:[%s3063_s24 + $0x198] sm:$0xff]  ;;  %v3228_v39 = vld [vmem:[%s3063_s24 + $0x1a0] sm:$0xff]  ;;  %v840_v49 = vld [vmem:[%s3063_s24 + $0x4a] sm:$0xff] }
  0x28   : > { %2495 = vmatmul.msk.f32.gmra.mxu3 %vm330_vm1, %v3092_v11  ;;  %v3211_v36 = vld [vmem:[%s3063_s24 + $0x78] sm:$0xff]  ;;  %v3231_v40 = vld [vmem:[%s3063_s24 + $0x80] sm:$0xff]  ;;  %v3284_v54 = vld [vmem:[%s3063_s24 + $0x6a] sm:$0xff] }
  0x29   : > { %2471 = vmatmul.msk.f32.gmra.mxu0 %vm330_vm1, %v3095_v12  ;;  %v287_v41 = vld [vmem:[%s3063_s24] sm:$0xff]  ;;  %v838_v43 = vld [vmem:[%s3063_s24 + $0x32] sm:$0xff] }
  0x2a   : > { %v834_v42 = vld [vmem:[%s3063_s24 + $0x2] sm:$0xff]  ;;  %v839_v46 = vld [vmem:[%s3063_s24 + $0x3a] sm:$0xff]  ;;  %v841_v52 = vld [vmem:[%s3063_s24 + $0x52] sm:$0xff] }
  0x2b   : > { %v289_v47 = vld [vmem:[%s3063_s24 + $0x18] sm:$0xff]  ;;  %v290_v50 = vld [vmem:[%s3063_s24 + $0x20] sm:$0xff] }
  0x2c   : > { %v836_v48 = vld [vmem:[%s3063_s24 + $0x1a] sm:$0xff]  ;;  %v837_v51 = vld [vmem:[%s3063_s24 + $0x22] sm:$0xff]  ;;  %v3318_v59 = vld [vmem:[%s3063_s24 + $0x92] sm:$0xff] }
  0x2d   : > { %v3274_v53 = vld [vmem:[%s3063_s24 + $0x62] sm:$0xff]  ;;  %v3294_v55 = vld [vmem:[%s3063_s24 + $0x7a] sm:$0xff]  ;;  %v3375_v25 = vld [vmem:[%s3063_s24 + $0xb2] sm:$0xff] }
  0x2e   : > { %2480 = vmatmul.msk.f32.gmra.mxu1 %vm330_vm1, %v3106_v13  ;;  %v3304_v56 = vld [vmem:[%s3063_s24 + $0x82] sm:$0xff]  ;;  %v3337_v0 = vld [vmem:[%s3063_s24 + $0x9a] sm:$0xff]  ;;  %4331 = vst [vmem:[#allocation11_spill] sm:$0xff] %v3375_v25 }
  0x2f   : > { %2488 = vmatmul.msk.f32.gmra.mxu2 %vm330_vm1, %v3109_v14 }
  0x30   : > { %2496 = vmatmul.msk.f32.gmra.mxu3 %vm330_vm1, %v3112_v15 }
  0x31   : > { %2472 = vmatmul.msk.f32.gmra.mxu0 %vm330_vm1, %v3115_v16 }
  0x36   : > { %2481 = vmatmul.msk.f32.gmra.mxu1 %vm330_vm1, %v3126_v17 }
  0x37   : > { %2489 = vmatmul.msk.f32.gmra.mxu2 %vm330_vm1, %v3129_v18 }
  0x38   : > { %2497 = vmatmul.msk.f32.gmra.mxu3 %vm330_vm1, %v3132_v19 }
  0x39   : > { %2473 = vmatmul.msk.f32.gmra.mxu0 %vm330_vm1, %v3135_v20 }
  0x3e   : > { %2482 = vmatmul.msk.f32.gmra.mxu1 %vm330_vm1, %v3146_v21 }
  0x3f   : > { %2490 = vmatmul.msk.f32.gmra.mxu2 %vm330_vm1, %v3149_v22 }
  0x40   : > { %2498 = vmatmul.msk.f32.gmra.mxu3 %vm330_vm1, %v3152_v23 }
  0x41   : > { %2474 = vmatmul.msk.f32.gmra.mxu0 %vm330_vm1, %v3155_v24 }
  0x46   : > { %2483 = vmatmul.msk.f32.gmra.mxu1 %vm330_vm1, %v3178_v28 }
  0x47   : > { %2491 = vmatmul.msk.f32.gmra.mxu2 %vm330_vm1, %v3181_v29 }
  0x48   : > { %2499 = vmatmul.msk.f32.gmra.mxu3 %vm330_vm1, %v3184_v30 }
  0x49   : > { %2475 = vmatmul.msk.f32.gmra.mxu0 %vm330_vm1, %v3187_v31 }
  0x4e   : > { %2484 = vmatmul.msk.f32.gmra.mxu1 %vm330_vm1, %v3202_v33 }
  0x4f   : > { %2492 = vmatmul.msk.f32.gmra.mxu2 %vm330_vm1, %v3205_v34 }
  0x50   : > { %2500 = vmatmul.msk.f32.gmra.mxu3 %vm330_vm1, %v3208_v35 }
  0x51   : > { %2476 = vmatmul.msk.f32.gmra.mxu0 %vm330_vm1, %v3211_v36 }
  0x56   : > { %2485 = vmatmul.msk.f32.gmra.mxu1 %vm330_vm1, %v3222_v37 }
  0x57   : > { %2493 = vmatmul.msk.f32.gmra.mxu2 %vm330_vm1, %v3225_v38 }
  0x58   : > { %2501 = vmatmul.msk.f32.gmra.mxu3 %vm330_vm1, %v3228_v39 }
  0x59   : > { %2477 = vmatmul.msk.f32.gmra.mxu0 %vm330_vm1, %v3231_v40 }
  0x5e   : > { %2503 = vmatmul.msk.f32.vlgmr.msrb.gmra.mxu1 %vm330_vm1, %v287_v41 }
  0x5f   : > { %2537 = vmatmul.msk.f32.vlgmr.msrb.gmra.mxu2 %vm330_vm1, %v3155_v24 }
  0x60   : > { %2571 = vmatmul.msk.f32.vlgmr.msrb.gmra.mxu3 %vm330_vm1, %v834_v42 }
  0x61   : > { %2605 = vmatmul.msk.f32.vlgmr.msrb.gmra.mxu0 %vm330_vm1, %v838_v43 }
  0x66   : > { %2504 = vmatmul.msk.f32.gmra.mxu1 %vm330_vm1, %v288_v44  ;;  %v3413_v44 = vld [vmem:[%s3063_s24 + $0xca] sm:$0xff] }
  0x67   : > { %2538 = vmatmul.msk.f32.gmra.mxu2 %vm330_vm1, %v3187_v31 }
  0x68   : > { %2572 = vmatmul.msk.f32.gmra.mxu3 %vm330_vm1, %v835_v45 }
  0x69   : > { %2606 = vmatmul.msk.f32.gmra.mxu0 %vm330_vm1, %v839_v46 }
  0x6e   : > { %2505 = vmatmul.msk.f32.gmra.mxu1 %vm330_vm1, %v289_v47 }
  0x6f   : > { %2539 = vmatmul.msk.f32.gmra.mxu2 %vm330_vm1, %v3211_v36 }
  0x70   : > { %2573 = vmatmul.msk.f32.gmra.mxu3 %vm330_vm1, %v836_v48  ;;  %v3432_v48 = vld [vmem:[%s3063_s24 + $0xda] sm:$0xff] }
  0x71   : > { %2607 = vmatmul.msk.f32.gmra.mxu0 %vm330_vm1, %v840_v49 }
  0x76   : > { %2506 = vmatmul.msk.f32.gmra.mxu1 %vm330_vm1, %v290_v50 }
  0x77   : > { %2540 = vmatmul.msk.f32.gmra.mxu2 %vm330_vm1, %v3231_v40 }
  0x78   : > { %2574 = vmatmul.msk.f32.gmra.mxu3 %vm330_vm1, %v837_v51 }
  0x79   : > { %2608 = vmatmul.msk.f32.gmra.mxu0 %vm330_vm1, %v841_v52 }
  0x7e   : > { %2507 = vmatmul.msk.f32.gmra.mxu1 %vm330_vm1, %v3079_v8  ;;  %v3356_v8 = vld [vmem:[%s3063_s24 + $0xaa] sm:$0xff] }
  0x7f   : > { %2541 = vmatmul.msk.f32.gmra.mxu2 %vm330_vm1, %v3066_v5 }
  0x80   : > { %2575 = vmatmul.msk.f32.gmra.mxu3 %vm330_vm1, %v838_v43 }
  0x81   : > { %2609 = vmatmul.msk.f32.gmra.mxu0 %vm330_vm1, %v3274_v53 }
  0x86   : > { %2508 = vmatmul.msk.f32.gmra.mxu1 %vm330_vm1, %v3095_v12 }
  0x87   : > { %2542 = vmatmul.msk.f32.gmra.mxu2 %vm330_vm1, %v3086_v9 }
  0x88   : > { %2576 = vmatmul.msk.f32.gmra.mxu3 %vm330_vm1, %v839_v46 }
  0x89   : > { %2610 = vmatmul.msk.f32.gmra.mxu0 %vm330_vm1, %v3284_v54 }
  0x8e   : > { %2509 = vmatmul.msk.f32.gmra.mxu1 %vm330_vm1, %v3115_v16 }
  0x8f   : > { %2543 = vmatmul.msk.f32.gmra.mxu2 %vm330_vm1, %v3106_v13 }
  0x90   : > { %2577 = vmatmul.msk.f32.gmra.mxu3 %vm330_vm1, %v840_v49 }
  0x91   : > { %2611 = vmatmul.msk.f32.gmra.mxu0 %vm330_vm1, %v3294_v55 }
  0x96   : > { %2510 = vmatmul.msk.f32.gmra.mxu1 %vm330_vm1, %v3135_v20 }
  0x97   : > { %2544 = vmatmul.msk.f32.gmra.mxu2 %vm330_vm1, %v3126_v17 }
  0x98   : > { %2578 = vmatmul.msk.f32.gmra.mxu3 %vm330_vm1, %v841_v52  ;;  %v3451_v52 = vld [vmem:[%s3063_s24 + $0xe2] sm:$0xff] }
  0x99   : > { %2612 = vmatmul.msk.f32.gmra.mxu0 %vm330_vm1, %v3304_v56 }
  0x9b   : > { %v3313_v57 = vpop.f32.mrf.mxu1 }
  0x9e   : > { %v3315_v58 = vpop.f32.mrf.mxu0  ;;  %2511 = vmatmul.msk.f32.gmra.mxu1 %vm330_vm1, %v3155_v24 }
  0x9f   : > { %2545 = vmatmul.msk.f32.gmra.mxu2 %vm330_vm1, %v3146_v21 }
  0xa0   : > { %2579 = vmatmul.msk.f32.gmra.mxu3 %vm330_vm1, %v3274_v53 }
  0xa1   : > { %2613 = vmatmul.msk.f32.gmra.mxu0 %vm330_vm1, %v3318_v59 }
  0xa2   : > { %v3328_v60 = vpop.f32.mrf.mxu2 }
  0xa3   : > { %v3330_v61 = vpop.f32.mrf.mxu3  ;;  %v3332_v62 = vpop.f32.mrf.mxu1 }
  0xa4   : > { %4328 = vst [vmem:[#allocation8_spill] sm:$0xff] %v3330_v61 }
  0xa6   : > { %v3334_v63 = vpop.f32.mrf.mxu0  ;;  %2512 = vmatmul.msk.f32.gmra.mxu1 %vm330_vm1, %v3187_v31 }
  0xa7   : > { %2546 = vmatmul.msk.f32.gmra.mxu2 %vm330_vm1, %v3178_v28 }
  0xa8   : > { %2580 = vmatmul.msk.f32.gmra.mxu3 %vm330_vm1, %v3284_v54 }
  0xa9   : > { %2614 = vmatmul.msk.f32.gmra.mxu0 %vm330_vm1, %v3337_v0 }
  0xaa   : > { %v3347_v1 = vpop.f32.mrf.mxu2 }
  0xab   : > { %v3349_v2 = vpop.f32.mrf.mxu3  ;;  %v3351_v3 = vpop.f32.mrf.mxu1 }
  0xac   : > { %4329 = vst [vmem:[#allocation9_spill] sm:$0xff] %v3349_v2 }
  0xae   : > { %v3353_v4 = vpop.f32.mrf.mxu0  ;;  %2513 = vmatmul.msk.f32.gmra.mxu1 %vm330_vm1, %v3211_v36  ;;  %v3394_v36 = vld [vmem:[%s3063_s24 + $0xc2] sm:$0xff] }
  0xaf   : > { %2547 = vmatmul.msk.f32.gmra.mxu2 %vm330_vm1, %v3202_v33 }
  0xb0   : > { %2581 = vmatmul.msk.f32.gmra.mxu3 %vm330_vm1, %v3294_v55 }
  0xb1   : > { %2615 = vmatmul.msk.f32.gmra.mxu0 %vm330_vm1, %v3356_v8 }
  0xb2   : > { %v3366_v12 = vpop.f32.mrf.mxu2 }
  0xb3   : > { %v3368_v16 = vpop.f32.mrf.mxu3  ;;  %v3370_v20 = vpop.f32.mrf.mxu1 }
  0xb4   : > { %4330 = vst [vmem:[#allocation10_spill] sm:$0xff] %v3368_v16 }
  0xb6   : > { %v3372_v24 = vpop.f32.mrf.mxu0  ;;  %2514 = vmatmul.msk.f32.gmra.mxu1 %vm330_vm1, %v3231_v40 }
  0xb7   : > { %2548 = vmatmul.msk.f32.gmra.mxu2 %vm330_vm1, %v3222_v37 }
  0xb8   : > { %2582 = vmatmul.msk.f32.gmra.mxu3 %vm330_vm1, %v3304_v56 }
  0xb9   : > { %2616 = vmatmul.msk.f32.gmra.mxu0 %vm330_vm1, %v3375_v25 }
  0xba   : > { %v3385_v26 = vpop.f32.mrf.mxu2 }
  0xbb   : > { %v3387_v27 = vpop.f32.mrf.mxu3  ;;  %v3389_v31 = vpop.f32.mrf.mxu1 }
  0xbc   : > { %4332 = vst [vmem:[#allocation12_spill] sm:$0xff] %v3387_v27  ;;  %v3466_v27 = vld [vmem:[%s3063_s24 + $0xf2] sm:$0xff] }
  0xbe   : > { %v3391_v32 = vpop.f32.mrf.mxu0  ;;  %2515 = vmatmul.msk.f32.gmra.mxu1 %vm330_vm1, %v3066_v5 }
  0xbf   : > { %2549 = vmatmul.msk.f32.gmra.mxu2 %vm330_vm1, %v3069_v6 }
  0xc0   : > { %2583 = vmatmul.msk.f32.gmra.mxu3 %vm330_vm1, %v3318_v59 }
  0xc1   : > { %2617 = vmatmul.msk.f32.gmra.mxu0 %vm330_vm1, %v3394_v36 }
  0xc2   : > { %v3404_v40 = vpop.f32.mrf.mxu2 }
  0xc3   : > { %v3406_v41 = vpop.f32.mrf.mxu3  ;;  %v3408_v42 = vpop.f32.mrf.mxu1 }
  0xc4   : > { %4333 = vst [vmem:[#allocation13_spill] sm:$0xff] %v3406_v41 }
  0xc6   : > { %v3410_v43 = vpop.f32.mrf.mxu0  ;;  %2516 = vmatmul.msk.f32.gmra.mxu1 %vm330_vm1, %v3086_v9 }
  0xc7   : > { %2550 = vmatmul.msk.f32.gmra.mxu2 %vm330_vm1, %v3089_v10 }
  0xc8   : > { %2584 = vmatmul.msk.f32.gmra.mxu3 %vm330_vm1, %v3337_v0 }
  0xc9   : > { %2618 = vmatmul.msk.f32.gmra.mxu0 %vm330_vm1, %v3413_v44 }
  0xca   : > { %v3423_v5 = vpop.f32.mrf.mxu2 }
  0xcb   : > { %v3425_v45 = vpop.f32.mrf.mxu3  ;;  %v3427_v46 = vpop.f32.mrf.mxu1 }
  0xcc   : > { %4334 = vst [vmem:[#allocation14_spill] sm:$0xff] %v3425_v45 }
  0xce   : > { %v3429_v47 = vpop.f32.mrf.mxu0  ;;  %2517 = vmatmul.msk.f32.gmra.mxu1 %vm330_vm1, %v3106_v13 }
  0xcf   : > { %2551 = vmatmul.msk.f32.gmra.mxu2 %vm330_vm1, %v3109_v14 }
  0xd0   : > { %2585 = vmatmul.msk.f32.gmra.mxu3 %vm330_vm1, %v3356_v8 }
  0xd1   : > { %2619 = vmatmul.msk.f32.gmra.mxu0 %vm330_vm1, %v3432_v48 }
  0xd2   : > { %v3442_v9 = vpop.f32.mrf.mxu2 }
  0xd3   : > { %4335 = vst [vmem:[#allocation15_spill] sm:$0xff] %v3442_v9  ;;  %v3444_v49 = vpop.f32.mrf.mxu3  ;;  %v3446_v50 = vpop.f32.mrf.mxu1  ;;  %v3478_v9 = vld [vmem:[%s3063_s24 + $0xfa] sm:$0xff] }
  0xd4   : > { %4336 = vst [vmem:[#allocation16_spill] sm:$0xff] %v3444_v49 }
  0xd6   : > { %v3448_v51 = vpop.f32.mrf.mxu0  ;;  %2518 = vmatmul.msk.f32.gmra.mxu1 %vm330_vm1, %v3126_v17 }
  0xd7   : > { %2552 = vmatmul.msk.f32.gmra.mxu2 %vm330_vm1, %v3129_v18 }
  0xd8   : > { %2586 = vmatmul.msk.f32.gmra.mxu3 %vm330_vm1, %v3375_v25 }
  0xd9   : > { %2620 = vmatmul.msk.f32.gmra.mxu0 %vm330_vm1, %v3451_v52 }
  0xda   : > { %v3461_v13 = vpop.f32.mrf.mxu2 }
  0xdb   : > { %4337 = vst [vmem:[#allocation17_spill] sm:$0xff] %v3461_v13  ;;  %v3463_v49 = vpop.f32.mrf.mxu3  ;;  %v576_v45 = vpop.f32.mrf.mxu1 }
  0xdc   : > { %4338 = vst [vmem:[#allocation18_spill] sm:$0xff] %v3463_v49  ;;  %v577_v17 = vadd.f32 %v576_v45, %v3315_v58 }
  0xde   : > { %v1154_v41 = vpop.f32.mrf.mxu0  ;;  %2519 = vmatmul.msk.f32.gmra.mxu1 %vm330_vm1, %v3146_v21 }
  0xdf   : > { %2553 = vmatmul.msk.f32.gmra.mxu2 %vm330_vm1, %v3149_v22 }
  0xe0   : > { %2587 = vmatmul.msk.f32.gmra.mxu3 %vm330_vm1, %v3394_v36 }
  0xe1   : > { %2621 = vmatmul.msk.f32.gmra.mxu0 %vm330_vm1, %v3466_v27 }
  0xe2   : > { %v706_v16 = vpop.f32.mrf.mxu2 }
  0xe3   : > { %v802_v49 = vadd.f32 %v706_v16, %v577_v17  ;;  %v992_v2 = vpop.f32.mrf.mxu3  ;;  %v579_v61 = vpop.f32.mrf.mxu1  ;;  %v3492_v17 = vld [vmem:[%s3063_s24 + $0x10a] sm:$0xff] }
  0xe4   : > { %v580_v58 = vadd.f32 %v579_v61, %v3334_v63 }
  0xe5   : > { %v1088_v13 = vadd.f32 %v992_v2, %v802_v49 }
  0xe6   : > { %v1157_v25 = vpop.f32.mrf.mxu0  ;;  %2520 = vmatmul.msk.f32.gmra.mxu1 %vm330_vm1, %v3178_v28 }
  0xe7   : > { %v3480_v21 = vadd.f32 %v1154_v41, %v1088_v13  ;;  %2554 = vmatmul.msk.f32.gmra.mxu2 %vm330_vm1, %v3181_v29 }
  0xe8   : > { %2588 = vmatmul.msk.f32.gmra.mxu3 %vm330_vm1, %v3413_v44 }
  0xe9   : > { %2622 = vmatmul.msk.f32.gmra.mxu0 %vm330_vm1, %v3478_v9 }
  0xea   : > { %v709_v2 = vpop.f32.mrf.mxu2 }
  0xeb   : > { %v803_v16 = vadd.f32 %v709_v2, %v580_v58  ;;  %v995_v45 = vpop.f32.mrf.mxu3  ;;  %v582_v49 = vpop.f32.mrf.mxu1 }
  0xec   : > { %v583_v61 = vadd.f32 %v582_v49, %v3353_v4 }
  0xed   : > { %v1089_v41 = vadd.f32 %v995_v45, %v803_v16 }
  0xee   : > { %v1160_v13 = vpop.f32.mrf.mxu0  ;;  %2521 = vmatmul.msk.f32.gmra.mxu1 %vm330_vm1, %v3202_v33 }
  0xef   : > { %v3494_v28 = vadd.f32 %v1157_v25, %v1089_v41  ;;  %2555 = vmatmul.msk.f32.gmra.mxu2 %vm330_vm1, %v3205_v34  ;;  %v3506_v41 = vld [vmem:[%s3063_s24 + $0x112] sm:$0xff] }
  0xf0   : > { %2589 = vmatmul.msk.f32.gmra.mxu3 %vm330_vm1, %v3432_v48 }
  0xf1   : > { %2623 = vmatmul.msk.f32.gmra.mxu0 %vm330_vm1, %v3492_v17 }
  0xf2   : > { %v712_v63 = vpop.f32.mrf.mxu2 }
  0xf3   : > { %v804_v58 = vadd.f32 %v712_v63, %v583_v61  ;;  %v998_v2 = vpop.f32.mrf.mxu3  ;;  %v585_v16 = vpop.f32.mrf.mxu1 }
  0xf4   : > { %v586_v4 = vadd.f32 %v585_v16, %v3372_v24 }
  0xf5   : > { %v1090_v25 = vadd.f32 %v998_v2, %v804_v58 }
  0xf6   : > { %v1163_v45 = vpop.f32.mrf.mxu0  ;;  %2522 = vmatmul.msk.f32.gmra.mxu1 %vm330_vm1, %v3222_v37 }
  0xf7   : > { %v3508_v33 = vadd.f32 %v1160_v13, %v1090_v25  ;;  %2556 = vmatmul.msk.f32.gmra.mxu2 %vm330_vm1, %v3225_v38  ;;  %v3520_v25 = vld [vmem:[%s3063_s24 + $0x122] sm:$0xff] }
  0xf8   : > { %2590 = vmatmul.msk.f32.gmra.mxu3 %vm330_vm1, %v3451_v52 }
  0xf9   : > { %2624 = vmatmul.msk.f32.gmra.mxu0 %vm330_vm1, %v3506_v41 }
  0xfa   : > { %v715_v49 = vpop.f32.mrf.mxu2 }
  0xfb   : > { %v805_v61 = vadd.f32 %v715_v49, %v586_v4  ;;  %v1001_v63 = vpop.f32.mrf.mxu3  ;;  %v588_v58 = vpop.f32.mrf.mxu1 }
  0xfc   : > { %v589_v24 = vadd.f32 %v588_v58, %v3391_v32 }
  0xfd   : > { %v1091_v13 = vadd.f32 %v1001_v63, %v805_v61 }
  0xfe   : > { %v1166_v2 = vpop.f32.mrf.mxu0  ;;  %2523 = vmatmul.msk.f32.gmra.mxu1 %vm330_vm1, %v3069_v6 }
  0xff   : > { %v3522_v37 = vadd.f32 %v1163_v45, %v1091_v13  ;;  %2557 = vmatmul.msk.f32.gmra.mxu2 %vm330_vm1, %v3072_v7  ;;  %v3534_v13 = vld [vmem:[%s3063_s24 + $0x12a] sm:$0xff] }
 0x100   : > { %2591 = vmatmul.msk.f32.gmra.mxu3 %vm330_vm1, %v3466_v27 }
 0x101   : > { %2625 = vmatmul.msk.f32.gmra.mxu0 %vm330_vm1, %v3520_v25 }
 0x102   : > { %v718_v16 = vpop.f32.mrf.mxu2 }
 0x103   : > { %v806_v4 = vadd.f32 %v718_v16, %v589_v24  ;;  %v1004_v49 = vpop.f32.mrf.mxu3  ;;  %v591_v61 = vpop.f32.mrf.mxu1 }
 0x104   : > { %v592_v32 = vadd.f32 %v591_v61, %v3410_v43 }
 0x105   : > { %v1092_v45 = vadd.f32 %v1004_v49, %v806_v4 }
 0x106   : > { %v1169_v63 = vpop.f32.mrf.mxu0  ;;  %2524 = vmatmul.msk.f32.gmra.mxu1 %vm330_vm1, %v3089_v10 }
 0x107   : > { %v3536_v6 = vadd.f32 %v1166_v2, %v1092_v45  ;;  %2558 = vmatmul.msk.f32.gmra.mxu2 %vm330_vm1, %v3092_v11  ;;  %v3548_v45 = vld [vmem:[%s3063_s24 + $0x13a] sm:$0xff] }
 0x108   : > { %2592 = vmatmul.msk.f32.gmra.mxu3 %vm330_vm1, %v3478_v9 }
 0x109   : > { %2626 = vmatmul.msk.f32.gmra.mxu0 %vm330_vm1, %v3534_v13 }
 0x10a   : > { %v721_v58 = vpop.f32.mrf.mxu2 }
 0x10b   : > { %v807_v24 = vadd.f32 %v721_v58, %v592_v32  ;;  %v1007_v16 = vpop.f32.mrf.mxu3  ;;  %v594_v4 = vpop.f32.mrf.mxu1 }
 0x10c   : > { %v595_v43 = vadd.f32 %v594_v4, %v3429_v47 }
 0x10d   : > { %v1093_v2 = vadd.f32 %v1007_v16, %v807_v24 }
 0x10e   : > { %v1172_v49 = vpop.f32.mrf.mxu0  ;;  %2525 = vmatmul.msk.f32.gmra.mxu1 %vm330_vm1, %v3109_v14 }
 0x10f   : > { %v3550_v10 = vadd.f32 %v1169_v63, %v1093_v2  ;;  %2559 = vmatmul.msk.f32.gmra.mxu2 %vm330_vm1, %v3112_v15  ;;  %v3562_v2 = vld [vmem:[%s3063_s24 + $0x142] sm:$0xff] }
 0x110   : > { %2593 = vmatmul.msk.f32.gmra.mxu3 %vm330_vm1, %v3492_v17 }
 0x111   : > { %2627 = vmatmul.msk.f32.gmra.mxu0 %vm330_vm1, %v3548_v45 }
 0x112   : > { %v724_v61 = vpop.f32.mrf.mxu2 }
 0x113   : > { %v808_v32 = vadd.f32 %v724_v61, %v595_v43  ;;  %v1010_v58 = vpop.f32.mrf.mxu3  ;;  %v597_v24 = vpop.f32.mrf.mxu1 }
 0x114   : > { %v598_v47 = vadd.f32 %v597_v24, %v3448_v51 }
 0x115   : > { %v1094_v63 = vadd.f32 %v1010_v58, %v808_v32 }
 0x116   : > { %v1175_v16 = vpop.f32.mrf.mxu0  ;;  %2526 = vmatmul.msk.f32.gmra.mxu1 %vm330_vm1, %v3129_v18 }
 0x117   : > { %v3564_v14 = vadd.f32 %v1172_v49, %v1094_v63  ;;  %2560 = vmatmul.msk.f32.gmra.mxu2 %vm330_vm1, %v3132_v19  ;;  %v3576_v63 = vld [vmem:[%s3063_s24 + $0x152] sm:$0xff] }
 0x118   : > { %2594 = vmatmul.msk.f32.gmra.mxu3 %vm330_vm1, %v3506_v41 }
 0x119   : > { %2628 = vmatmul.msk.f32.gmra.mxu0 %vm330_vm1, %v3562_v2 }
 0x11a   : > { %v727_v4 = vpop.f32.mrf.mxu2 }
 0x11b   : > { %v809_v43 = vadd.f32 %v727_v4, %v598_v47  ;;  %v1013_v61 = vpop.f32.mrf.mxu3  ;;  %v600_v32 = vpop.f32.mrf.mxu1 }
 0x11c   : > { %v601_v51 = vadd.f32 %v600_v32, %v3313_v57 }
 0x11d   : > { %v1095_v49 = vadd.f32 %v1013_v61, %v809_v43 }
 0x11e   : > { %v1178_v58 = vpop.f32.mrf.mxu0  ;;  %2527 = vmatmul.msk.f32.gmra.mxu1 %vm330_vm1, %v3149_v22 }
 0x11f   : > { %v3578_v18 = vadd.f32 %v1175_v16, %v1095_v49  ;;  %2561 = vmatmul.msk.f32.gmra.mxu2 %vm330_vm1, %v3152_v23  ;;  %v3590_v49 = vld [vmem:[%s3063_s24 + $0x15a] sm:$0xff] }
 0x120   : > { %2595 = vmatmul.msk.f32.gmra.mxu3 %vm330_vm1, %v3520_v25 }
 0x121   : > { %2629 = vmatmul.msk.f32.gmra.mxu0 %vm330_vm1, %v3576_v63 }
 0x122   : > { %v730_v24 = vpop.f32.mrf.mxu2 }
 0x123   : > { %v810_v47 = vadd.f32 %v730_v24, %v601_v51  ;;  %v1016_v4 = vpop.f32.mrf.mxu3  ;;  %v603_v43 = vpop.f32.mrf.mxu1 }
 0x124   : > { %v604_v23 = vadd.f32 %v603_v43, %v3332_v62 }
 0x125   : > { %v1096_v16 = vadd.f32 %v1016_v4, %v810_v47  ;;  %v3604_v4 = vld [vmem:[%s3063_s24 + $0x16a] sm:$0xff] }
 0x126   : > { %v1181_v61 = vpop.f32.mrf.mxu0  ;;  %2528 = vmatmul.msk.f32.gmra.mxu1 %vm330_vm1, %v3181_v29 }
 0x127   : > { %v3592_v22 = vadd.f32 %v1178_v58, %v1096_v16  ;;  %2562 = vmatmul.msk.f32.gmra.mxu2 %vm330_vm1, %v3184_v30 }
 0x128   : > { %2596 = vmatmul.msk.f32.gmra.mxu3 %vm330_vm1, %v3534_v13 }
 0x129   : > { %2630 = vmatmul.msk.f32.gmra.mxu0 %vm330_vm1, %v3590_v49 }
 0x12a   : > { %v733_v57 = vpop.f32.mrf.mxu2 }
 0x12b   : > { %v811_v32 = vadd.f32 %v733_v57, %v604_v23  ;;  %v1019_v51 = vpop.f32.mrf.mxu3  ;;  %v606_v24 = vpop.f32.mrf.mxu1 }
 0x12c   : > { %v607_v30 = vadd.f32 %v606_v24, %v3351_v3 }
 0x12d   : > { %v1097_v58 = vadd.f32 %v1019_v51, %v811_v32 }
 0x12e   : > { %v1184_v47 = vpop.f32.mrf.mxu0  ;;  %2529 = vmatmul.msk.f32.gmra.mxu1 %vm330_vm1, %v3205_v34  ;;  %v3618_v34 = vld [vmem:[%s3063_s24 + $0x172] sm:$0xff] }
 0x12f   : > { %v3606_v29 = vadd.f32 %v1181_v61, %v1097_v58  ;;  %2563 = vmatmul.msk.f32.gmra.mxu2 %vm330_vm1, %v3208_v35 }
 0x130   : > { %2597 = vmatmul.msk.f32.gmra.mxu3 %vm330_vm1, %v3548_v45 }
 0x131   : > { %2631 = vmatmul.msk.f32.gmra.mxu0 %vm330_vm1, %v3604_v4 }
 0x132   : > { %v736_v62 = vpop.f32.mrf.mxu2 }
 0x133   : > { %v812_v43 = vadd.f32 %v736_v62, %v607_v30  ;;  %v1022_v16 = vpop.f32.mrf.mxu3  ;;  %v609_v61 = vpop.f32.mrf.mxu1  ;;  %v3633_v62 = vld [vmem:[%s3063_s24 + $0x182] sm:$0xff] }
 0x134   : > { %v610_v35 = vadd.f32 %v609_v61, %v3370_v20 }
 0x135   : > { %v1098_v23 = vadd.f32 %v1022_v16, %v812_v43 }
 0x136   : > { %v1187_v57 = vpop.f32.mrf.mxu0  ;;  %2530 = vmatmul.msk.f32.gmra.mxu1 %vm330_vm1, %v3225_v38 }
 0x137   : > { %v3620_v32 = vadd.f32 %v1184_v47, %v1098_v23  ;;  %2564 = vmatmul.msk.f32.gmra.mxu2 %vm330_vm1, %v3228_v39  ;;  %v323_v47 = vld [vmem:[%s3063_s24 + $0x1b0] sm:$0xff] }
 0x138   : > { %2598 = vmatmul.msk.f32.gmra.mxu3 %vm330_vm1, %v3562_v2 }
 0x139   : > { %2632 = vmatmul.msk.f32.gmra.mxu0 %vm330_vm1, %v3618_v34 }
 0x13a   : > { %v739_v3 = vpop.f32.mrf.mxu2 }
 0x13b   : > { %v813_v51 = vadd.f32 %v739_v3, %v610_v35  ;;  %v1025_v24 = vpop.f32.mrf.mxu3  ;;  %v612_v58 = vpop.f32.mrf.mxu1 }
 0x13c   : > { %v613_v20 = vadd.f32 %v612_v58, %v3389_v31 }
 0x13d   : > { %v1099_v30 = vadd.f32 %v1025_v24, %v813_v51 }
 0x13e   : > { %v1190_v38 = vpop.f32.mrf.mxu0  ;;  %2531 = vmatmul.msk.f32.gmra.mxu1 %vm330_vm1, %v3072_v7  ;;  %v3647_v7 = vld [vmem:[%s3063_s24 + $0x18a] sm:$0xff] }
 0x13f   : > { %v3635_v39 = vadd.f32 %v1187_v57, %v1099_v30  ;;  %2565 = vmatmul.msk.f32.gmra.mxu2 %vm330_vm1, %v323_v47  ;;  %v324_v57 = vld [vmem:[%s3063_s24 + $0x1b8] sm:$0xff] }
 0x140   : > { %2599 = vmatmul.msk.f32.gmra.mxu3 %vm330_vm1, %v3576_v63 }
 0x141   : > { %2633 = vmatmul.msk.f32.gmra.mxu0 %vm330_vm1, %v3633_v62 }
 0x142   : > { %v742_v43 = vpop.f32.mrf.mxu2 }
 0x143   : > { %v814_v16 = vadd.f32 %v742_v43, %v613_v20  ;;  %v1028_v61 = vpop.f32.mrf.mxu3  ;;  %v615_v23 = vpop.f32.mrf.mxu1 }
 0x144   : > { %v616_v31 = vadd.f32 %v615_v23, %v3408_v42 }
 0x145   : > { %v1100_v35 = vadd.f32 %v1028_v61, %v814_v16 }
 0x146   : > { %v1193_v3 = vpop.f32.mrf.mxu0  ;;  %2532 = vmatmul.msk.f32.gmra.mxu1 %vm330_vm1, %v3092_v11  ;;  %v3661_v11 = vld [vmem:[%s3063_s24 + $0x19a] sm:$0xff] }
 0x147   : > { %v3649_v51 = vadd.f32 %v1190_v38, %v1100_v35  ;;  %2566 = vmatmul.msk.f32.gmra.mxu2 %vm330_vm1, %v324_v57  ;;  %v325_v38 = vld [vmem:[%s3063_s24 + $0x1c8] sm:$0xff] }
 0x148   : > { %2600 = vmatmul.msk.f32.gmra.mxu3 %vm330_vm1, %v3590_v49 }
 0x149   : > { %2634 = vmatmul.msk.f32.gmra.mxu0 %vm330_vm1, %v3647_v7 }
 0x14a   : > { %v745_v24 = vpop.f32.mrf.mxu2 }
 0x14b   : > { %v815_v58 = vadd.f32 %v745_v24, %v616_v31  ;;  %v1031_v47 = vpop.f32.mrf.mxu3  ;;  %v618_v30 = vpop.f32.mrf.mxu1 }
 0x14c   : > { %v619_v42 = vadd.f32 %v618_v30, %v3427_v46 }
 0x14d   : > { %v1101_v20 = vadd.f32 %v1031_v47, %v815_v58 }
 0x14e   : > { %v1196_v43 = vpop.f32.mrf.mxu0  ;;  %2533 = vmatmul.msk.f32.gmra.mxu1 %vm330_vm1, %v3112_v15  ;;  %v3675_v15 = vld [vmem:[%s3063_s24 + $0x1a2] sm:$0xff] }
 0x14f   : > { %v3663_v16 = vadd.f32 %v1193_v3, %v1101_v20  ;;  %2567 = vmatmul.msk.f32.gmra.mxu2 %vm330_vm1, %v325_v38  ;;  %v326_v3 = vld [vmem:[%s3063_s24 + $0x1d0] sm:$0xff] }
 0x150   : > { %2601 = vmatmul.msk.f32.gmra.mxu3 %vm330_vm1, %v3604_v4 }
 0x151   : > { %2635 = vmatmul.msk.f32.gmra.mxu0 %vm330_vm1, %v3661_v11 }
 0x152   : > { %v748_v61 = vpop.f32.mrf.mxu2 }
 0x153   : > { %v816_v23 = vadd.f32 %v748_v61, %v619_v42  ;;  %v1034_v57 = vpop.f32.mrf.mxu3  ;;  %v621_v35 = vpop.f32.mrf.mxu1  ;;  %v3689_v61 = vld [vmem:[%s3063_s24 + $0x34] sm:$0xff] }
 0x154   : > { %v622_v46 = vadd.f32 %v621_v35, %v3446_v50 }
 0x155   : > { %v1102_v31 = vadd.f32 %v1034_v57, %v816_v23  ;;  %v3692_v23 = vld [vmem:[%s3063_s24 + $0x64] sm:$0xff] }
 0x156   : > { %v1199_v24 = vpop.f32.mrf.mxu0  ;;  %2534 = vmatmul.msk.f32.gmra.mxu1 %vm330_vm1, %v3132_v19 }
 0x157   : > { %v3677_v58 = vadd.f32 %v1196_v43, %v1102_v31  ;;  %2568 = vmatmul.msk.f32.gmra.mxu2 %vm330_vm1, %v326_v3  ;;  %v1444_v43 = vld [vmem:[%s3063_s24 + $0x4] sm:$0xff] }
 0x158   : > { %2602 = vmatmul.msk.f32.gmra.mxu3 %vm330_vm1, %v3618_v34 }
 0x159   : > { %2636 = vmatmul.msk.f32.gmra.mxu0 %vm330_vm1, %v3675_v15 }
 0x15a   : > { %v751_v47 = vpop.f32.mrf.mxu2 }
 0x15b   : > { %v817_v30 = vadd.f32 %v751_v47, %v622_v46  ;;  %v1037_v38 = vpop.f32.mrf.mxu3  ;;  %v624_v20 = vpop.f32.mrf.mxu1 }
 0x15c   : > { %v625_v50 = vadd.f32 %v624_v20, %v3328_v60 }
 0x15d   : > { %v1103_v42 = vadd.f32 %v1037_v38, %v817_v30  ;;  %v1449_v30 = vld [vmem:[%s3063_s24 + $0x3c] sm:$0xff]  ;;  %v3707_v38 = vld [vmem:[%s3063_s24 + $0x6c] sm:$0xff] }
 0x15e   : > { %v1202_v19 = vpop.f32.mrf.mxu0  ;;  %2639 = vmatmul.msk.f32.vlgmr.msra.gmra.mxu1 %vm330_vm1, %v3274_v53 }
 0x15f   : > { %v3694_v57 = vadd.f32 %v1199_v24, %v1103_v42  ;;  %2673 = vmatmul.msk.f32.vlgmr.msra.gmra.mxu2 %vm330_vm1, %v1444_v43  ;;  %v1445_v24 = vld [vmem:[%s3063_s24 + $0xc] sm:$0xff] }
 0x160   : > { %2707 = vmatmul.msk.f32.vlgmr.msra.gmra.mxu3 %vm330_vm1, %v3689_v61 }
 0x161   : > { %2741 = vmatmul.msk.f32.vlgmr.msra.gmra.mxu0 %vm330_vm1, %v3692_v23 }
 0x162   : > { %v754_v35 = vpop.f32.mrf.mxu2 }
 0x163   : > { %v818_v3 = vadd.f32 %v754_v35, %v625_v50  ;;  %v1040_v31 = vpop.f32.mrf.mxu3  ;;  %v627_v46 = vpop.f32.mrf.mxu1 }
 0x164   : > { %v628_v60 = vadd.f32 %v627_v46, %v3347_v1 }
 0x165   : > { %v1104_v47 = vadd.f32 %v1040_v31, %v818_v3  ;;  %v1446_v3 = vld [vmem:[%s3063_s24 + $0x1c] sm:$0xff]  ;;  %v1450_v31 = vld [vmem:[%s3063_s24 + $0x4c] sm:$0xff] }
 0x166   : > { %v1205_v53 = vpop.f32.mrf.mxu0  ;;  %2640 = vmatmul.msk.f32.gmra.mxu1 %vm330_vm1, %v3284_v54  ;;  %v3721_v54 = vld [vmem:[%s3063_s24 + $0x7c] sm:$0xff] }
 0x167   : > { %v3709_v43 = vadd.f32 %v1202_v19, %v1104_v47  ;;  %2674 = vmatmul.msk.f32.gmra.mxu2 %vm330_vm1, %v1445_v24 }
 0x168   : > { %2708 = vmatmul.msk.f32.gmra.mxu3 %vm330_vm1, %v1449_v30 }
 0x169   : > { %4339 = vst [vmem:[#allocation19_spill] sm:$0xff] %v3709_v43  ;;  %2742 = vmatmul.msk.f32.gmra.mxu0 %vm330_vm1, %v3707_v38 }
 0x16a   : > { %v757_v20 = vpop.f32.mrf.mxu2 }
 0x16b   : > { %v819_v42 = vadd.f32 %v757_v20, %v628_v60  ;;  %v1043_v50 = vpop.f32.mrf.mxu3  ;;  %v630_v35 = vpop.f32.mrf.mxu1 }
 0x16c   : > { %v631_v1 = vadd.f32 %v630_v35, %v3366_v12 }
 0x16d   : > { %v1105_v19 = vadd.f32 %v1043_v50, %v819_v42  ;;  %v1447_v50 = vld [vmem:[%s3063_s24 + $0x24] sm:$0xff] }
 0x16e   : > { %v1208_v47 = vpop.f32.mrf.mxu0  ;;  %2641 = vmatmul.msk.f32.gmra.mxu1 %vm330_vm1, %v3294_v55 }
 0x16f   : > { %v3723_v24 = vadd.f32 %v1205_v53, %v1105_v19  ;;  %2675 = vmatmul.msk.f32.gmra.mxu2 %vm330_vm1, %v1446_v3  ;;  %v1451_v53 = vld [vmem:[%s3063_s24 + $0x54] sm:$0xff] }
 0x170   : > { %2709 = vmatmul.msk.f32.gmra.mxu3 %vm330_vm1, %v1450_v31 }
 0x171   : > { %4340 = vst [vmem:[#allocation20_spill] sm:$0xff] %v3723_v24  ;;  %2743 = vmatmul.msk.f32.gmra.mxu0 %vm330_vm1, %v3721_v54  ;;  %v3735_v24 = vld [vmem:[%s3063_s24 + $0x84] sm:$0xff] }
 0x172   : > { %v760_v46 = vpop.f32.mrf.mxu2 }
 0x173   : > { %v820_v60 = vadd.f32 %v760_v46, %v631_v1  ;;  %v1046_v20 = vpop.f32.mrf.mxu3  ;;  %v633_v42 = vpop.f32.mrf.mxu1 }
 0x174   : > { %v634_v12 = vadd.f32 %v633_v42, %v3385_v26 }
 0x175   : > { %v1106_v43 = vadd.f32 %v1046_v20, %v820_v60 }
 0x176   : > { %v1211_v19 = vpop.f32.mrf.mxu0  ;;  %2642 = vmatmul.msk.f32.gmra.mxu1 %vm330_vm1, %v3304_v56 }
 0x177   : > { %v3737_v55 = vadd.f32 %v1208_v47, %v1106_v43  ;;  %2676 = vmatmul.msk.f32.gmra.mxu2 %vm330_vm1, %v1447_v50  ;;  %v3747_v47 = vld [vmem:[%s3063_s24 + $0x94] sm:$0xff] }
 0x178   : > { %2710 = vmatmul.msk.f32.gmra.mxu3 %vm330_vm1, %v1451_v53 }
 0x179   : > { %2744 = vmatmul.msk.f32.gmra.mxu0 %vm330_vm1, %v3735_v24 }
 0x17a   : > { %v763_v35 = vpop.f32.mrf.mxu2 }
 0x17b   : > { %v821_v3 = vadd.f32 %v763_v35, %v634_v12  ;;  %v1049_v1 = vpop.f32.mrf.mxu3  ;;  %v636_v46 = vpop.f32.mrf.mxu1 }
 0x17c   : > { %v637_v56 = vadd.f32 %v636_v46, %v3404_v40 }
 0x17d   : > { %v1107_v60 = vadd.f32 %v1049_v1, %v821_v3  ;;  %v3761_v3 = vld [vmem:[%s3063_s24 + $0x9c] sm:$0xff] }
 0x17e   : > { %v1214_v43 = vpop.f32.mrf.mxu0  ;;  %2643 = vmatmul.msk.f32.gmra.mxu1 %vm330_vm1, %v3318_v59 }
 0x17f   : > { %v3749_v20 = vadd.f32 %v1211_v19, %v1107_v60  ;;  %2677 = vmatmul.msk.f32.gmra.mxu2 %vm330_vm1, %v3689_v61 }
 0x180   : > { %2711 = vmatmul.msk.f32.gmra.mxu3 %vm330_vm1, %v3692_v23 }
 0x181   : > { %2745 = vmatmul.msk.f32.gmra.mxu0 %vm330_vm1, %v3747_v47 }
 0x182   : > { %v766_v26 = vpop.f32.mrf.mxu2 }
 0x183   : > { %v822_v42 = vadd.f32 %v766_v26, %v637_v56  ;;  %v1052_v50 = vpop.f32.mrf.mxu3  ;;  %v639_v12 = vpop.f32.mrf.mxu1  ;;  %v3774_v26 = vld [vmem:[%s3063_s24 + $0xac] sm:$0xff] }
 0x184   : > { %v640_v40 = vadd.f32 %v639_v12, %v3423_v5  ;;  %v4341_v5 = vld [vmem:[#allocation15_spill] sm:$0xff] }
 0x185   : > { %v1108_v19 = vadd.f32 %v1052_v50, %v822_v42 }
 0x186   : > { %v1217_v35 = vpop.f32.mrf.mxu0  ;;  %2644 = vmatmul.msk.f32.gmra.mxu1 %vm330_vm1, %v3337_v0 }
 0x187   : > { %v3763_v59 = vadd.f32 %v1214_v43, %v1108_v19  ;;  %2678 = vmatmul.msk.f32.gmra.mxu2 %vm330_vm1, %v1449_v30 }
 0x188   : > { %2712 = vmatmul.msk.f32.gmra.mxu3 %vm330_vm1, %v3707_v38 }
 0x189   : > { %2746 = vmatmul.msk.f32.gmra.mxu0 %vm330_vm1, %v3761_v3 }
 0x18a   : > { %v769_v61 = vpop.f32.mrf.mxu2 }
 0x18b   : > { %v823_v1 = vadd.f32 %v769_v61, %v640_v40  ;;  %v1055_v46 = vpop.f32.mrf.mxu3  ;;  %v642_v60 = vpop.f32.mrf.mxu1  ;;  %v3787_v61 = vld [vmem:[%s3063_s24 + $0xb4] sm:$0xff] }
 0x18c   : > { %v643_v30 = vadd.f32 %v642_v60, %v4341_v5 }
 0x18d   : > { %v1109_v43 = vadd.f32 %v1055_v46, %v823_v1  ;;  %v4343_v1 = vld [vmem:[#allocation17_spill] sm:$0xff] }
 0x18e   : > { %v1220_v56 = vpop.f32.mrf.mxu0  ;;  %2645 = vmatmul.msk.f32.gmra.mxu1 %vm330_vm1, %v3356_v8 }
 0x18f   : > { %v3776_v0 = vadd.f32 %v1217_v35, %v1109_v43  ;;  %2679 = vmatmul.msk.f32.gmra.mxu2 %vm330_vm1, %v1450_v31  ;;  %v4342_v31 = vld [vmem:[#allocation11_spill] sm:$0xff] }
 0x190   : > { %2713 = vmatmul.msk.f32.gmra.mxu3 %vm330_vm1, %v3721_v54 }
 0x191   : > { %2747 = vmatmul.msk.f32.gmra.mxu0 %vm330_vm1, %v3774_v26 }
 0x192   : > { %v772_v42 = vpop.f32.mrf.mxu2 }
 0x193   : > { %v824_v50 = vadd.f32 %v772_v42, %v643_v30  ;;  %v1058_v12 = vpop.f32.mrf.mxu3  ;;  %v645_v19 = vpop.f32.mrf.mxu1 }
 0x194   : > { %v646_v46 = vadd.f32 %v645_v19, %v4343_v1 }
 0x195   : > { %v1110_v35 = vadd.f32 %v1058_v12, %v824_v50  ;;  %v3800_v50 = vld [vmem:[%s3063_s24 + $0xc4] sm:$0xff] }
 0x196   : > { %v1223_v40 = vpop.f32.mrf.mxu0  ;;  %2646 = vmatmul.msk.f32.gmra.mxu1 %vm330_vm1, %v4342_v31 }
 0x197   : > { %v3789_v8 = vadd.f32 %v1220_v56, %v1110_v35  ;;  %2680 = vmatmul.msk.f32.gmra.mxu2 %vm330_vm1, %v1451_v53  ;;  %v4344_v53 = vld [vmem:[#allocation8_spill] sm:$0xff] }
 0x198   : > { %2714 = vmatmul.msk.f32.gmra.mxu3 %vm330_vm1, %v3735_v24 }
 0x199   : > { %2748 = vmatmul.msk.f32.gmra.mxu0 %vm330_vm1, %v3787_v61 }
 0x19a   : > { %v775_v60 = vpop.f32.mrf.mxu2 }
 0x19b   : > { %v825_v43 = vadd.f32 %v775_v60, %v646_v46  ;;  %v1061_v5 = vpop.f32.mrf.mxu3  ;;  %v648_v30 = vpop.f32.mrf.mxu1 }
 0x19c   : > { %v649_v19 = vadd.f32 %v648_v30, %v4344_v53 }
 0x19d   : > { %v1111_v56 = vadd.f32 %v1061_v5, %v825_v43  ;;  %v3814_v43 = vld [vmem:[%s3063_s24 + $0xcc] sm:$0xff] }
 0x19e   : > { %v1226_v42 = vpop.f32.mrf.mxu0  ;;  %2647 = vmatmul.msk.f32.gmra.mxu1 %vm330_vm1, %v3394_v36 }
 0x19f   : > { %v3802_v12 = vadd.f32 %v1223_v40, %v1111_v56  ;;  %2681 = vmatmul.msk.f32.gmra.mxu2 %vm330_vm1, %v3692_v23  ;;  %v4345_v23 = vld [vmem:[#allocation9_spill] sm:$0xff] }
 0x1a0   : > { %2715 = vmatmul.msk.f32.gmra.mxu3 %vm330_vm1, %v3747_v47 }
 0x1a1   : > { %2749 = vmatmul.msk.f32.gmra.mxu0 %vm330_vm1, %v3800_v50 }
 0x1a2   : > { %v778_v35 = vpop.f32.mrf.mxu2 }
 0x1a3   : > { %v826_v31 = vadd.f32 %v778_v35, %v649_v19  ;;  %v1064_v1 = vpop.f32.mrf.mxu3  ;;  %v651_v46 = vpop.f32.mrf.mxu1 }
 0x1a4   : > { %v652_v5 = vadd.f32 %v651_v46, %v4345_v23 }
 0x1a5   : > { %v1112_v40 = vadd.f32 %v1064_v1, %v826_v31  ;;  %v3828_v31 = vld [vmem:[%s3063_s24 + $0xdc] sm:$0xff] }
 0x1a6   : > { %v1229_v60 = vpop.f32.mrf.mxu0  ;;  %2648 = vmatmul.msk.f32.gmra.mxu1 %vm330_vm1, %v3413_v44 }
 0x1a7   : > { %v3816_v36 = vadd.f32 %v1226_v42, %v1112_v40  ;;  %2682 = vmatmul.msk.f32.gmra.mxu2 %vm330_vm1, %v3707_v38  ;;  %v4346_v38 = vld [vmem:[#allocation10_spill] sm:$0xff] }
 0x1a8   : > { %2716 = vmatmul.msk.f32.gmra.mxu3 %vm330_vm1, %v3761_v3 }
 0x1a9   : > { %2750 = vmatmul.msk.f32.gmra.mxu0 %vm330_vm1, %v3814_v43 }
 0x1aa   : > { %v781_v30 = vpop.f32.mrf.mxu2 }
 0x1ab   : > { %v827_v56 = vadd.f32 %v781_v30, %v652_v5  ;;  %v1067_v53 = vpop.f32.mrf.mxu3  ;;  %v654_v19 = vpop.f32.mrf.mxu1 }
 0x1ac   : > { %v655_v1 = vadd.f32 %v654_v19, %v4346_v38 }
 0x1ad   : > { %v1113_v42 = vadd.f32 %v1067_v53, %v827_v56  ;;  %v3842_v56 = vld [vmem:[%s3063_s24 + $0xe4] sm:$0xff] }
 0x1ae   : > { %v1232_v35 = vpop.f32.mrf.mxu0  ;;  %2649 = vmatmul.msk.f32.gmra.mxu1 %vm330_vm1, %v3432_v48 }
 0x1af   : > { %v3830_v44 = vadd.f32 %v1229_v60, %v1113_v42  ;;  %2683 = vmatmul.msk.f32.gmra.mxu2 %vm330_vm1, %v3721_v54  ;;  %v4347_v54 = vld [vmem:[#allocation12_spill] sm:$0xff] }
 0x1b0   : > { %2717 = vmatmul.msk.f32.gmra.mxu3 %vm330_vm1, %v3774_v26 }
 0x1b1   : > { %2751 = vmatmul.msk.f32.gmra.mxu0 %vm330_vm1, %v3828_v31 }
 0x1b2   : > { %v784_v46 = vpop.f32.mrf.mxu2 }
 0x1b3   : > { %v828_v40 = vadd.f32 %v784_v46, %v655_v1  ;;  %v1070_v23 = vpop.f32.mrf.mxu3  ;;  %v657_v5 = vpop.f32.mrf.mxu1 }
 0x1b4   : > { %v658_v53 = vadd.f32 %v657_v5, %v4347_v54 }
 0x1b5   : > { %v1114_v60 = vadd.f32 %v1070_v23, %v828_v40  ;;  %v3856_v40 = vld [vmem:[%s3063_s24 + $0xf4] sm:$0xff] }
 0x1b6   : > { %v1235_v30 = vpop.f32.mrf.mxu0  ;;  %2650 = vmatmul.msk.f32.gmra.mxu1 %vm330_vm1, %v3451_v52 }
 0x1b7   : > { %v3844_v48 = vadd.f32 %v1232_v35, %v1114_v60  ;;  %2684 = vmatmul.msk.f32.gmra.mxu2 %vm330_vm1, %v3735_v24  ;;  %v4348_v24 = vld [vmem:[#allocation13_spill] sm:$0xff] }
 0x1b8   : > { %2718 = vmatmul.msk.f32.gmra.mxu3 %vm330_vm1, %v3787_v61 }
 0x1b9   : > { %2752 = vmatmul.msk.f32.gmra.mxu0 %vm330_vm1, %v3842_v56 }
 0x1ba   : > { %v787_v19 = vpop.f32.mrf.mxu2 }
 0x1bb   : > { %v829_v42 = vadd.f32 %v787_v19, %v658_v53  ;;  %v1073_v38 = vpop.f32.mrf.mxu3  ;;  %v660_v1 = vpop.f32.mrf.mxu1 }
 0x1bc   : > { %v661_v23 = vadd.f32 %v660_v1, %v4348_v24 }
 0x1bd   : > { %v1115_v35 = vadd.f32 %v1073_v38, %v829_v42  ;;  %v3870_v42 = vld [vmem:[%s3063_s24 + $0xfc] sm:$0xff] }
 0x1be   : > { %v1238_v46 = vpop.f32.mrf.mxu0  ;;  %2651 = vmatmul.msk.f32.gmra.mxu1 %vm330_vm1, %v3466_v27 }
 0x1bf   : > { %v3858_v52 = vadd.f32 %v1235_v30, %v1115_v35  ;;  %2685 = vmatmul.msk.f32.gmra.mxu2 %vm330_vm1, %v3747_v47  ;;  %v4349_v47 = vld [vmem:[#allocation14_spill] sm:$0xff] }
 0x1c0   : > { %2719 = vmatmul.msk.f32.gmra.mxu3 %vm330_vm1, %v3800_v50 }
 0x1c1   : > { %2753 = vmatmul.msk.f32.gmra.mxu0 %vm330_vm1, %v3856_v40 }
 0x1c2   : > { %v790_v5 = vpop.f32.mrf.mxu2 }
 0x1c3   : > { %v830_v60 = vadd.f32 %v790_v5, %v661_v23  ;;  %v1076_v54 = vpop.f32.mrf.mxu3  ;;  %v663_v53 = vpop.f32.mrf.mxu1 }
 0x1c4   : > { %v664_v38 = vadd.f32 %v663_v53, %v4349_v47 }
 0x1c5   : > { %v1116_v30 = vadd.f32 %v1076_v54, %v830_v60  ;;  %v3884_v60 = vld [vmem:[%s3063_s24 + $0x10c] sm:$0xff] }
 0x1c6   : > { %v1241_v19 = vpop.f32.mrf.mxu0  ;;  %2652 = vmatmul.msk.f32.gmra.mxu1 %vm330_vm1, %v3478_v9 }
 0x1c7   : > { %v3872_v27 = vadd.f32 %v1238_v46, %v1116_v30  ;;  %2686 = vmatmul.msk.f32.gmra.mxu2 %vm330_vm1, %v3761_v3  ;;  %v4350_v3 = vld [vmem:[#allocation16_spill] sm:$0xff] }
 0x1c8   : > { %2720 = vmatmul.msk.f32.gmra.mxu3 %vm330_vm1, %v3814_v43 }
 0x1c9   : > { %2754 = vmatmul.msk.f32.gmra.mxu0 %vm330_vm1, %v3870_v42 }
 0x1ca   : > { %v793_v1 = vpop.f32.mrf.mxu2 }
 0x1cb   : > { %v831_v35 = vadd.f32 %v793_v1, %v664_v38  ;;  %v1079_v24 = vpop.f32.mrf.mxu3  ;;  %v666_v23 = vpop.f32.mrf.mxu1 }
 0x1cc   : > { %v667_v54 = vadd.f32 %v666_v23, %v4350_v3 }
 0x1cd   : > { %v1117_v46 = vadd.f32 %v1079_v24, %v831_v35  ;;  %v3898_v35 = vld [vmem:[%s3063_s24 + $0x114] sm:$0xff] }
 0x1ce   : > { %v1244_v5 = vpop.f32.mrf.mxu0  ;;  %2653 = vmatmul.msk.f32.gmra.mxu1 %vm330_vm1, %v3492_v17 }
 0x1cf   : > { %v3886_v9 = vadd.f32 %v1241_v19, %v1117_v46  ;;  %2687 = vmatmul.msk.f32.gmra.mxu2 %vm330_vm1, %v3774_v26  ;;  %v4351_v26 = vld [vmem:[#allocation18_spill] sm:$0xff] }
 0x1d0   : > { %2721 = vmatmul.msk.f32.gmra.mxu3 %vm330_vm1, %v3828_v31 }
 0x1d1   : > { %2755 = vmatmul.msk.f32.gmra.mxu0 %vm330_vm1, %v3884_v60 }
 0x1d2   : > { %v796_v53 = vpop.f32.mrf.mxu2 }
 0x1d3   : > { %v832_v30 = vadd.f32 %v796_v53, %v667_v54  ;;  %v1082_v47 = vpop.f32.mrf.mxu3  ;;  %v669_v38 = vpop.f32.mrf.mxu1 }
 0x1d4   : > { %v670_v24 = vadd.f32 %v669_v38, %v4351_v26 }
 0x1d5   : > { %v1118_v19 = vadd.f32 %v1082_v47, %v832_v30 }
 0x1d6   : > { %v1247_v1 = vpop.f32.mrf.mxu0  ;;  %2654 = vmatmul.msk.f32.gmra.mxu1 %vm330_vm1, %v3506_v41  ;;  %v3912_v41 = vld [vmem:[%s3063_s24 + $0x124] sm:$0xff] }
 0x1d7   : > { %v3900_v17 = vadd.f32 %v1244_v5, %v1118_v19  ;;  %2688 = vmatmul.msk.f32.gmra.mxu2 %vm330_vm1, %v3787_v61 }
 0x1d8   : > { %2722 = vmatmul.msk.f32.gmra.mxu3 %vm330_vm1, %v3842_v56 }
 0x1d9   : > { %2756 = vmatmul.msk.f32.gmra.mxu0 %vm330_vm1, %v3898_v35 }
 0x1da   : > { %v799_v23 = vpop.f32.mrf.mxu2 }
 0x1db   : > { %v833_v46 = vadd.f32 %v799_v23, %v670_v24  ;;  %v1085_v3 = vpop.f32.mrf.mxu3  ;;  %v1316_v5 = vpop.f32.mrf.mxu1  ;;  %v3927_v23 = vld [vmem:[%s3063_s24 + $0x12c] sm:$0xff] }
 0x1dc   : > { %v1412_v61 = vadd.f32 %v1316_v5, %v3480_v21 }
 0x1dd   : > { %v1119_v54 = vadd.f32 %v1085_v3, %v833_v46 }
 0x1de   : > { %v1926_v53 = vpop.f32.mrf.mxu0  ;;  %2655 = vmatmul.msk.f32.gmra.mxu1 %vm330_vm1, %v3520_v25 }
 0x1df   : > { %v3914_v30 = vadd.f32 %v1247_v1, %v1119_v54  ;;  %2689 = vmatmul.msk.f32.gmra.mxu2 %vm330_vm1, %v3800_v50 }
 0x1e0   : > { %2723 = vmatmul.msk.f32.gmra.mxu3 %vm330_vm1, %v3856_v40 }
 0x1e1   : > { %2757 = vmatmul.msk.f32.gmra.mxu0 %vm330_vm1, %v3912_v41 }
 0x1e2   : > { %v1602_v47 = vpop.f32.mrf.mxu2 }
 0x1e3   : > { %v1698_v38 = vadd.f32 %v1602_v47, %v1412_v61  ;;  %v1764_v19 = vpop.f32.mrf.mxu3  ;;  %v1319_v1 = vpop.f32.mrf.mxu1 }
 0x1e4   : > { %v1413_v21 = vadd.f32 %v1319_v1, %v3494_v28 }
 0x1e5   : > { %v1860_v26 = vadd.f32 %v1764_v19, %v1698_v38 }
 0x1e6   : > { %v1929_v24 = vpop.f32.mrf.mxu0  ;;  %2656 = vmatmul.msk.f32.gmra.mxu1 %vm330_vm1, %v3534_v13 }
 0x1e7   : > { %v2022_v25 = vadd.f32 %v1926_v53, %v1860_v26  ;;  %2690 = vmatmul.msk.f32.gmra.mxu2 %vm330_vm1, %v3814_v43  ;;  %v3946_v53 = vld [vmem:[%s3063_s24 + $0x13c] sm:$0xff] }
 0x1e8   : > { %2724 = vmatmul.msk.f32.gmra.mxu3 %vm330_vm1, %v3870_v42 }
 0x1e9   : > { %2758 = vmatmul.msk.f32.gmra.mxu0 %vm330_vm1, %v3927_v23  ;;  %2055 = vst.msk [vmem:[%s3932_s14] sm:$0xff] %vm2054_vm2, %v2022_v25  ;;  %v2158_v43 = vmul.f32 %v2022_v25, %v2022_v25  ;;  %v2087_v28 = vsel %vm2054_vm2, %v2022_v25, 0.0 }
 0x1ea   : > { %v1605_v50 = vpop.f32.mrf.mxu2 }
 0x1eb   : > { %v1699_v46 = vadd.f32 %v1605_v50, %v1413_v21  ;;  %v1767_v3 = vpop.f32.mrf.mxu3  ;;  %v1322_v5 = vpop.f32.mrf.mxu1 }
 0x1ec   : > { %v1414_v47 = vadd.f32 %v1322_v5, %v3508_v33 }
 0x1ed   : > { %v1861_v54 = vadd.f32 %v1767_v3, %v1699_v46 }
 0x1ee   : > { %v1932_v13 = vpop.f32.mrf.mxu0  ;;  %2657 = vmatmul.msk.f32.gmra.mxu1 %vm330_vm1, %v3548_v45 }
 0x1ef   : > { %v2023_v61 = vadd.f32 %v1929_v24, %v1861_v54  ;;  %2691 = vmatmul.msk.f32.gmra.mxu2 %vm330_vm1, %v3828_v31  ;;  %v2190_v31 = vsel %vm2054_vm2, %v2158_v43, 0.0  ;;  %v3964_v54 = vld [vmem:[%s3063_s24 + $0x144] sm:$0xff] }
 0x1f0   : > { %2725 = vmatmul.msk.f32.gmra.mxu3 %vm330_vm1, %v3884_v60 }
 0x1f1   : > { %2759 = vmatmul.msk.f32.gmra.mxu0 %vm330_vm1, %v3946_v53  ;;  %2056 = vst.msk [vmem:[%s3932_s14 + $0x8] sm:$0xff] %vm2054_vm2, %v2023_v61  ;;  %v2088_v38 = vsel %vm2054_vm2, %v2023_v61, 0.0  ;;  %v2159_v19 = vmul.f32 %v2023_v61, %v2023_v61 }
 0x1f2   : > { %v2089_v45 = vadd.f32 %v2088_v38, %v2087_v28  ;;  %v1608_v1 = vpop.f32.mrf.mxu2 }
 0x1f3   : > { %v2191_v26 = vsel %vm2054_vm2, %v2159_v19, 0.0  ;;  %v1700_v24 = vadd.f32 %v1608_v1, %v1414_v47  ;;  %v1770_v21 = vpop.f32.mrf.mxu3  ;;  %v1325_v46 = vpop.f32.mrf.mxu1 }
 0x1f4   : > { %v2192_v50 = vadd.f32 %v2191_v26, %v2190_v31  ;;  %v1415_v5 = vadd.f32 %v1325_v46, %v3522_v37  ;;  %v3980_v26 = vld [vmem:[%s3063_s24 + $0x154] sm:$0xff] }
 0x1f5   : > { %v1862_v3 = vadd.f32 %v1770_v21, %v1700_v24 }
 0x1f6   : > { %v1935_v25 = vpop.f32.mrf.mxu0  ;;  %2658 = vmatmul.msk.f32.gmra.mxu1 %vm330_vm1, %v3562_v2 }
 0x1f7   : > { %v2024_v33 = vadd.f32 %v1932_v13, %v1862_v3  ;;  %2692 = vmatmul.msk.f32.gmra.mxu2 %vm330_vm1, %v3842_v56 }
 0x1f8   : > { %2726 = vmatmul.msk.f32.gmra.mxu3 %vm330_vm1, %v3898_v35 }
 0x1f9   : > { %2760 = vmatmul.msk.f32.gmra.mxu0 %vm330_vm1, %v3964_v54  ;;  %2057 = vst.msk [vmem:[%s3932_s14 + $0x10] sm:$0xff] %vm2054_vm2, %v2024_v33  ;;  %v2090_v43 = vsel %vm2054_vm2, %v2024_v33, 0.0  ;;  %v2160_v13 = vmul.f32 %v2024_v33, %v2024_v33 }
 0x1fa   : > { %v2091_v61 = vadd.f32 %v2090_v43, %v2089_v45  ;;  %v1611_v2 = vpop.f32.mrf.mxu2 }
 0x1fb   : > { %v2193_v28 = vsel %vm2054_vm2, %v2160_v13, 0.0  ;;  %v1701_v56 = vadd.f32 %v1611_v2, %v1415_v5  ;;  %v1773_v47 = vpop.f32.mrf.mxu3  ;;  %v1328_v19 = vpop.f32.mrf.mxu1  ;;  %v3996_v13 = vld [vmem:[%s3063_s24 + $0x15c] sm:$0xff] }
 0x1fc   : > { %v2194_v38 = vadd.f32 %v2193_v28, %v2192_v50  ;;  %v1416_v37 = vadd.f32 %v1328_v19, %v3536_v6 }
 0x1fd   : > { %v1863_v1 = vadd.f32 %v1773_v47, %v1701_v56 }
 0x1fe   : > { %v1938_v31 = vpop.f32.mrf.mxu0  ;;  %2659 = vmatmul.msk.f32.gmra.mxu1 %vm330_vm1, %v3576_v63 }
 0x1ff   : > { %v2025_v24 = vadd.f32 %v1935_v25, %v1863_v1  ;;  %2693 = vmatmul.msk.f32.gmra.mxu2 %vm330_vm1, %v3856_v40 }
 0x200   : > { %2727 = vmatmul.msk.f32.gmra.mxu3 %vm330_vm1, %v3912_v41 }
 0x201   : > { %2761 = vmatmul.msk.f32.gmra.mxu0 %vm330_vm1, %v3980_v26  ;;  %2058 = vst.msk [vmem:[%s3932_s14 + $0x18] sm:$0xff] %vm2054_vm2, %v2025_v24  ;;  %v2092_v45 = vsel %vm2054_vm2, %v2025_v24, 0.0  ;;  %v2161_v21 = vmul.f32 %v2025_v24, %v2025_v24 }
 0x202   : > { %v2093_v50 = vadd.f32 %v2092_v45, %v2091_v61  ;;  %v1614_v63 = vpop.f32.mrf.mxu2 }
 0x203   : > { %v2195_v46 = vsel %vm2054_vm2, %v2161_v21, 0.0  ;;  %v1702_v40 = vadd.f32 %v1614_v63, %v1416_v37  ;;  %v1776_v3 = vpop.f32.mrf.mxu3  ;;  %v1331_v33 = vpop.f32.mrf.mxu1  ;;  %v4012_v37 = vld [vmem:[%s3063_s24 + $0x16c] sm:$0xff] }
 0x204   : > { %v2196_v25 = vadd.f32 %v2195_v46, %v2194_v38  ;;  %v1417_v6 = vadd.f32 %v1331_v33, %v3550_v10 }
 0x205   : > { %v1864_v5 = vadd.f32 %v1776_v3, %v1702_v40 }
 0x206   : > { %v1941_v43 = vpop.f32.mrf.mxu0  ;;  %2660 = vmatmul.msk.f32.gmra.mxu1 %vm330_vm1, %v3590_v49 }
 0x207   : > { %v2026_v2 = vadd.f32 %v1938_v31, %v1864_v5  ;;  %2694 = vmatmul.msk.f32.gmra.mxu2 %vm330_vm1, %v3870_v42 }
 0x208   : > { %2728 = vmatmul.msk.f32.gmra.mxu3 %vm330_vm1, %v3927_v23 }
 0x209   : > { %2762 = vmatmul.msk.f32.gmra.mxu0 %vm330_vm1, %v3996_v13  ;;  %2059 = vst.msk [vmem:[%s3932_s14 + $0x20] sm:$0xff] %vm2054_vm2, %v2026_v2  ;;  %v2094_v61 = vsel %vm2054_vm2, %v2026_v2, 0.0  ;;  %v2162_v28 = vmul.f32 %v2026_v2, %v2026_v2 }
 0x20a   : > { %v2095_v56 = vadd.f32 %v2094_v61, %v2093_v50  ;;  %v1617_v49 = vpop.f32.mrf.mxu2 }
 0x20b   : > { %v2197_v47 = vsel %vm2054_vm2, %v2162_v28, 0.0  ;;  %v1703_v42 = vadd.f32 %v1617_v49, %v1417_v6  ;;  %v1779_v38 = vpop.f32.mrf.mxu3  ;;  %v1334_v1 = vpop.f32.mrf.mxu1 }
 0x20c   : > { %v2198_v19 = vadd.f32 %v2197_v47, %v2196_v25  ;;  %v1418_v10 = vadd.f32 %v1334_v1, %v3564_v14  ;;  %v4044_v1 = vld [vmem:[%s3063_s24 + $0x184] sm:$0xff] }
 0x20d   : > { %v1865_v31 = vadd.f32 %v1779_v38, %v1703_v42 }
 0x20e   : > { %v1944_v24 = vpop.f32.mrf.mxu0  ;;  %2661 = vmatmul.msk.f32.gmra.mxu1 %vm330_vm1, %v3604_v4 }
 0x20f   : > { %v2027_v45 = vadd.f32 %v1941_v43, %v1865_v31  ;;  %2695 = vmatmul.msk.f32.gmra.mxu2 %vm330_vm1, %v3884_v60  ;;  %v4028_v43 = vld [vmem:[%s3063_s24 + $0x174] sm:$0xff] }
 0x210   : > { %2729 = vmatmul.msk.f32.gmra.mxu3 %vm330_vm1, %v3946_v53 }
 0x211   : > { %2763 = vmatmul.msk.f32.gmra.mxu0 %vm330_vm1, %v4012_v37  ;;  %2060 = vst.msk [vmem:[%s3932_s14 + $0x28] sm:$0xff] %vm2054_vm2, %v2027_v45  ;;  %v2096_v21 = vsel %vm2054_vm2, %v2027_v45, 0.0  ;;  %v2163_v50 = vmul.f32 %v2027_v45, %v2027_v45 }
 0x212   : > { %v2097_v63 = vadd.f32 %v2096_v21, %v2095_v56  ;;  %v1620_v4 = vpop.f32.mrf.mxu2 }
 0x213   : > { %v2199_v46 = vsel %vm2054_vm2, %v2163_v50, 0.0  ;;  %v1704_v60 = vadd.f32 %v1620_v4, %v1418_v10  ;;  %v1782_v40 = vpop.f32.mrf.mxu3  ;;  %v1337_v25 = vpop.f32.mrf.mxu1 }
 0x214   : > { %v2200_v3 = vadd.f32 %v2199_v46, %v2198_v19  ;;  %v1419_v14 = vadd.f32 %v1337_v25, %v3578_v18 }
 0x215   : > { %v1866_v33 = vadd.f32 %v1782_v40, %v1704_v60  ;;  %v4060_v40 = vld [vmem:[%s3063_s24 + $0x18c] sm:$0xff] }
 0x216   : > { %v1947_v5 = vpop.f32.mrf.mxu0  ;;  %2662 = vmatmul.msk.f32.gmra.mxu1 %vm330_vm1, %v3618_v34 }
 0x217   : > { %v2028_v2 = vadd.f32 %v1944_v24, %v1866_v33  ;;  %2696 = vmatmul.msk.f32.gmra.mxu2 %vm330_vm1, %v3898_v35 }
 0x218   : > { %2730 = vmatmul.msk.f32.gmra.mxu3 %vm330_vm1, %v3964_v54 }
 0x219   : > { %2764 = vmatmul.msk.f32.gmra.mxu0 %vm330_vm1, %v4028_v43  ;;  %2061 = vst.msk [vmem:[%s3932_s14 + $0x30] sm:$0xff] %vm2054_vm2, %v2028_v2  ;;  %v2098_v6 = vsel %vm2054_vm2, %v2028_v2, 0.0  ;;  %v2164_v61 = vmul.f32 %v2028_v2, %v2028_v2 }
 0x21a   : > { %v2099_v28 = vadd.f32 %v2098_v6, %v2097_v63  ;;  %v1623_v34 = vpop.f32.mrf.mxu2 }
 0x21b   : > { %v2201_v56 = vsel %vm2054_vm2, %v2164_v61, 0.0  ;;  %v1705_v35 = vadd.f32 %v1623_v34, %v1419_v14  ;;  %v1785_v49 = vpop.f32.mrf.mxu3  ;;  %v1340_v42 = vpop.f32.mrf.mxu1 }
 0x21c   : > { %v2202_v47 = vadd.f32 %v2201_v56, %v2200_v3  ;;  %v1420_v18 = vadd.f32 %v1340_v42, %v3592_v22  ;;  %v4076_v56 = vld [vmem:[%s3063_s24 + $0x19c] sm:$0xff] }
 0x21d   : > { %v1867_v38 = vadd.f32 %v1785_v49, %v1705_v35 }
 0x21e   : > { %v1950_v19 = vpop.f32.mrf.mxu0  ;;  %2663 = vmatmul.msk.f32.gmra.mxu1 %vm330_vm1, %v3633_v62 }
 0x21f   : > { %v2029_v31 = vadd.f32 %v1947_v5, %v1867_v38  ;;  %2697 = vmatmul.msk.f32.gmra.mxu2 %vm330_vm1, %v3912_v41 }
 0x220   : > { %2731 = vmatmul.msk.f32.gmra.mxu3 %vm330_vm1, %v3980_v26 }
 0x221   : > { %2765 = vmatmul.msk.f32.gmra.mxu0 %vm330_vm1, %v4044_v1  ;;  %2062 = vst.msk [vmem:[%s3932_s14 + $0x38] sm:$0xff] %vm2054_vm2, %v2029_v31  ;;  %v2100_v24 = vsel %vm2054_vm2, %v2029_v31, 0.0  ;;  %v2165_v45 = vmul.f32 %v2029_v31, %v2029_v31 }
 0x222   : > { %v2101_v10 = vadd.f32 %v2100_v24, %v2099_v28  ;;  %v1626_v62 = vpop.f32.mrf.mxu2 }
 0x223   : > { %v2203_v21 = vsel %vm2054_vm2, %v2165_v45, 0.0  ;;  %v1706_v41 = vadd.f32 %v1626_v62, %v1420_v18  ;;  %v1788_v50 = vpop.f32.mrf.mxu3  ;;  %v1343_v4 = vpop.f32.mrf.mxu1 }
 0x224   : > { %v2204_v63 = vadd.f32 %v2203_v21, %v2202_v47  ;;  %v1421_v22 = vadd.f32 %v1343_v4, %v3606_v29 }
 0x225   : > { %v1868_v46 = vadd.f32 %v1788_v50, %v1706_v41 }
 0x226   : > { %v1953_v60 = vpop.f32.mrf.mxu0  ;;  %2664 = vmatmul.msk.f32.gmra.mxu1 %vm330_vm1, %v3647_v7 }
 0x227   : > { %v2030_v3 = vadd.f32 %v1950_v19, %v1868_v46  ;;  %2698 = vmatmul.msk.f32.gmra.mxu2 %vm330_vm1, %v3927_v23 }
 0x228   : > { %2732 = vmatmul.msk.f32.gmra.mxu3 %vm330_vm1, %v3996_v13 }
 0x229   : > { %2766 = vmatmul.msk.f32.gmra.mxu0 %vm330_vm1, %v4060_v40  ;;  %2063 = vst.msk [vmem:[%s3932_s14 + $0x40] sm:$0xff] %vm2054_vm2, %v2030_v3  ;;  %v2102_v25 = vsel %vm2054_vm2, %v2030_v3, 0.0  ;;  %v2166_v33 = vmul.f32 %v2030_v3, %v2030_v3  ;;  %v870_v3 = vld [vmem:[%s3063_s24 + $0x1b2] sm:$0xff] }
 0x22a   : > { %v2103_v5 = vadd.f32 %v2102_v25, %v2101_v10  ;;  %v1629_v7 = vpop.f32.mrf.mxu2  ;;  %v4092_v10 = vld [vmem:[%s3063_s24 + $0x1a4] sm:$0xff] }
 0x22b   : > { %v2205_v2 = vsel %vm2054_vm2, %v2166_v33, 0.0  ;;  %v1707_v23 = vadd.f32 %v1629_v7, %v1421_v22  ;;  %v1791_v14 = vpop.f32.mrf.mxu3  ;;  %v1346_v61 = vpop.f32.mrf.mxu1  ;;  %v1480_v33 = vld [vmem:[%s3063_s24 + $0x1b4] sm:$0xff] }
 0x22c   : > { %v2206_v6 = vadd.f32 %v2205_v2, %v2204_v63  ;;  %v1422_v29 = vadd.f32 %v1346_v61, %v3620_v32 }
 0x22d   : > { %v1869_v28 = vadd.f32 %v1791_v14, %v1707_v23 }
 0x22e   : > { %v1956_v34 = vpop.f32.mrf.mxu0  ;;  %2665 = vmatmul.msk.f32.gmra.mxu1 %vm330_vm1, %v3661_v11 }
 0x22f   : > { %v2031_v35 = vadd.f32 %v1953_v60, %v1869_v28  ;;  %2699 = vmatmul.msk.f32.gmra.mxu2 %vm330_vm1, %v3946_v53 }
 0x230   : > { %2733 = vmatmul.msk.f32.gmra.mxu3 %vm330_vm1, %v4012_v37 }
 0x231   : > { %2767 = vmatmul.msk.f32.gmra.mxu0 %vm330_vm1, %v4076_v56  ;;  %2064 = vst.msk [vmem:[%s3932_s14 + $0x48] sm:$0xff] %vm2054_vm2, %v2031_v35  ;;  %v2104_v49 = vsel %vm2054_vm2, %v2031_v35, 0.0  ;;  %v2167_v47 = vmul.f32 %v2031_v35, %v2031_v35 }
 0x232   : > { %v2105_v42 = vadd.f32 %v2104_v49, %v2103_v5  ;;  %v1632_v11 = vpop.f32.mrf.mxu2  ;;  %v1481_v49 = vld [vmem:[%s3063_s24 + $0x1bc] sm:$0xff] }
 0x233   : > { %v2207_v38 = vsel %vm2054_vm2, %v2167_v47, 0.0  ;;  %v1708_v53 = vadd.f32 %v1632_v11, %v1422_v29  ;;  %v1794_v19 = vpop.f32.mrf.mxu3  ;;  %v1349_v18 = vpop.f32.mrf.mxu1 }
 0x234   : > { %v2208_v31 = vadd.f32 %v2207_v38, %v2206_v6  ;;  %v1423_v32 = vadd.f32 %v1349_v18, %v3635_v39 }
 0x235   : > { %v1870_v24 = vadd.f32 %v1794_v19, %v1708_v53 }
 0x236   : > { %v1959_v45 = vpop.f32.mrf.mxu0  ;;  %2666 = vmatmul.msk.f32.gmra.mxu1 %vm330_vm1, %v3675_v15 }
 0x237   : > { %v2032_v62 = vadd.f32 %v1956_v34, %v1870_v24  ;;  %2700 = vmatmul.msk.f32.gmra.mxu2 %vm330_vm1, %v3964_v54 }
 0x238   : > { %2734 = vmatmul.msk.f32.gmra.mxu3 %vm330_vm1, %v4028_v43 }
 0x239   : > { %2768 = vmatmul.msk.f32.gmra.mxu0 %vm330_vm1, %v4092_v10  ;;  %2065 = vst.msk [vmem:[%s3932_s14 + $0x50] sm:$0xff] %vm2054_vm2, %v2032_v62  ;;  %v2106_v21 = vsel %vm2054_vm2, %v2032_v62, 0.0  ;;  %v2168_v41 = vmul.f32 %v2032_v62, %v2032_v62 }
 0x23a   : > { %v2107_v50 = vadd.f32 %v2106_v21, %v2105_v42  ;;  %v1635_v63 = vpop.f32.mrf.mxu2 }
 0x23b   : > { %v2209_v15 = vsel %vm2054_vm2, %v2168_v41, 0.0  ;;  %v1709_v54 = vadd.f32 %v1635_v63, %v1423_v32  ;;  %v1797_v4 = vpop.f32.mrf.mxu3  ;;  %v1352_v60 = vpop.f32.mrf.mxu1  ;;  %v1482_v32 = vld [vmem:[%s3063_s24 + $0x1cc] sm:$0xff] }
 0x23c   : > { %v2210_v46 = vadd.f32 %v2209_v15, %v2208_v31  ;;  %v1424_v39 = vadd.f32 %v1352_v60, %v3649_v51 }
 0x23d   : > { %v1871_v22 = vadd.f32 %v1797_v4, %v1709_v54 }
 0x23e   : > { %v1962_v25 = vpop.f32.mrf.mxu0  ;;  %2667 = vmatmul.msk.f32.gmra.mxu1 %vm330_vm1, %v870_v3 }
 0x23f   : > { %v2033_v5 = vadd.f32 %v1959_v45, %v1871_v22  ;;  %2701 = vmatmul.msk.f32.gmra.mxu2 %vm330_vm1, %v3980_v26 }
 0x240   : > { %2735 = vmatmul.msk.f32.gmra.mxu3 %vm330_vm1, %v4044_v1  ;;  %v871_v1 = vld [vmem:[%s3063_s24 + $0x1ba] sm:$0xff] }
 0x241   : > { %2769 = vmatmul.msk.f32.gmra.mxu0 %vm330_vm1, %v1480_v33  ;;  %2066 = vst.msk [vmem:[%s3932_s14 + $0x58] sm:$0xff] %vm2054_vm2, %v2033_v5  ;;  %v2108_v7 = vsel %vm2054_vm2, %v2033_v5, 0.0  ;;  %v2169_v2 = vmul.f32 %v2033_v5, %v2033_v5 }
 0x242   : > { %v2109_v23 = vadd.f32 %v2108_v7, %v2107_v50  ;;  %v1638_v14 = vpop.f32.mrf.mxu2 }
 0x243   : > { %v2211_v6 = vsel %vm2054_vm2, %v2169_v2, 0.0  ;;  %v1710_v61 = vadd.f32 %v1638_v14, %v1424_v39  ;;  %v1800_v26 = vpop.f32.mrf.mxu3  ;;  %v1355_v34 = vpop.f32.mrf.mxu1 }
 0x244   : > { %v2212_v28 = vadd.f32 %v2211_v6, %v2210_v46  ;;  %v1425_v51 = vadd.f32 %v1355_v34, %v3663_v16  ;;  %v4352_v34 = vld [vmem:[#allocation19_spill] sm:$0xff] }
 0x245   : > { %v1872_v35 = vadd.f32 %v1800_v26, %v1710_v61 }
 0x246   : > { %v1965_v29 = vpop.f32.mrf.mxu0  ;;  %2668 = vmatmul.msk.f32.gmra.mxu1 %vm330_vm1, %v871_v1 }
 0x247   : > { %v2034_v47 = vadd.f32 %v1962_v25, %v1872_v35  ;;  %2702 = vmatmul.msk.f32.gmra.mxu2 %vm330_vm1, %v3996_v13  ;;  %v1483_v25 = vld [vmem:[%s3063_s24 + $0x1d4] sm:$0xff] }
 0x248   : > { %2736 = vmatmul.msk.f32.gmra.mxu3 %vm330_vm1, %v4060_v40  ;;  %v872_v40 = vld [vmem:[%s3063_s24 + $0x1ca] sm:$0xff] }
 0x249   : > { %2770 = vmatmul.msk.f32.gmra.mxu0 %vm330_vm1, %v1481_v49  ;;  %2067 = vst.msk [vmem:[%s3932_s14 + $0x60] sm:$0xff] %vm2054_vm2, %v2034_v47  ;;  %v2110_v42 = vsel %vm2054_vm2, %v2034_v47, 0.0  ;;  %v2170_v11 = vmul.f32 %v2034_v47, %v2034_v47 }
 0x24a   : > { %v2111_v38 = vadd.f32 %v2110_v42, %v2109_v23  ;;  %v1641_v53 = vpop.f32.mrf.mxu2 }
 0x24b   : > { %v2213_v19 = vsel %vm2054_vm2, %v2170_v11, 0.0  ;;  %v1711_v31 = vadd.f32 %v1641_v53, %v1425_v51  ;;  %v1803_v13 = vpop.f32.mrf.mxu3  ;;  %v1358_v24 = vpop.f32.mrf.mxu1 }
 0x24c   : > { %v2214_v18 = vadd.f32 %v2213_v19, %v2212_v28  ;;  %v1426_v16 = vadd.f32 %v1358_v24, %v3677_v58 }
 0x24d   : > { %v1873_v45 = vadd.f32 %v1803_v13, %v1711_v31  ;;  %v4353_v13 = vld [vmem:[#allocation20_spill] sm:$0xff] }
 0x24e   : > { %v1968_v62 = vpop.f32.mrf.mxu0  ;;  %2669 = vmatmul.msk.f32.gmra.mxu1 %vm330_vm1, %v872_v40 }
 0x24f   : > { %v2035_v21 = vadd.f32 %v1965_v29, %v1873_v45  ;;  %2703 = vmatmul.msk.f32.gmra.mxu2 %vm330_vm1, %v4012_v37 }
 0x250   : > { %2737 = vmatmul.msk.f32.gmra.mxu3 %vm330_vm1, %v4076_v56  ;;  %v873_v56 = vld [vmem:[%s3063_s24 + $0x1d2] sm:$0xff]  ;;  %s2285_s24 = scalar_lea.hbm %s4323_s3, %s2942_s18  ;;  %s2269_s18 = scalar_lea.sflag [#allocation3], %s4244_s11 }
 0x251   : > { %2771 = vmatmul.msk.f32.gmra.mxu0 %vm330_vm1, %v1482_v32  ;;  %2068 = vst.msk [vmem:[%s3932_s14 + $0x68] sm:$0xff] %vm2054_vm2, %v2035_v21  ;;  %v2112_v41 = vsel %vm2054_vm2, %v2035_v21, 0.0  ;;  %v2171_v50 = vmul.f32 %v2035_v21, %v2035_v21  ;;  %s4257_s7 = sshll.u32 %s2285_s24, 4  ;;  %s2290_s7 = int_to_ptr.hbm [resolvable:$true] %s4257_s7 }
 0x252   : > { %v2113_v63 = vadd.f32 %v2112_v41, %v2111_v38  ;;  %v1644_v15 = vpop.f32.mrf.mxu2  ;;  %s2854_s12 = sshra.s32 %s2290_s7, 4  ;;  %s2855_s12 = int_to_ptr.hbm [resolvable:$true] %s2854_s12 }
 0x253   : > { %v2215_v54 = vsel %vm2054_vm2, %v2171_v50, 0.0  ;;  %v1712_v4 = vadd.f32 %v1644_v15, %v1426_v16  ;;  %v1806_v37 = vpop.f32.mrf.mxu3  ;;  %v1361_v60 = vpop.f32.mrf.mxu1  ;;  %s2856_s13 = scalar_lea.hbm %s2855_s12, 1  ;;  %p2861_p1 = scmp.lt.s32.totalorder %s2855_s12, %s4323_s3 }
 0x254   : > { %v2216_v46 = vadd.f32 %v2215_v54, %v2214_v18  ;;  %v1427_v58 = vadd.f32 %v1361_v60, %v3694_v57  ;;  %p2857_p12 = scmp.ne.s32.totalorder %s2855_s12, %s2856_s13  ;;  %p2862_p2 = scmp.lt.s32.totalorder %s2860_s22, %s2856_s13 }
 0x255   : > { %v1874_v3 = vadd.f32 %v1806_v37, %v1712_v4 }
 0x256   : > { %v1971_v22 = vpop.f32.mrf.mxu0  ;;  %2670 = vmatmul.msk.f32.gmra.mxu1 %vm330_vm1, %v873_v56  ;;  %p2858_p13 = pnand %p2857_p12, %p3017_p4  ;;  %p2863_p3 = por %p2862_p2, %p2861_p1 }
 0x257   : > { %v2036_v33 = vadd.f32 %v1968_v62, %v1874_v3  ;;  %2704 = vmatmul.msk.f32.gmra.mxu2 %vm330_vm1, %v4028_v43 }
 0x258   : > { %2738 = vmatmul.msk.f32.gmra.mxu3 %vm330_vm1, %v4092_v10  ;;  %p2859_p0 = pneg %p2858_p13 }
 0x259   : > { %2772 = vmatmul.msk.f32.gmra.mxu0 %vm330_vm1, %v1483_v25  ;;  %2069 = vst.msk [vmem:[%s3932_s14 + $0x70] sm:$0xff] %vm2054_vm2, %v2036_v33  ;;  %v2114_v5 = vsel %vm2054_vm2, %v2036_v33, 0.0  ;;  %v2172_v39 = vmul.f32 %v2036_v33, %v2036_v33 }
 0x25a   : > { %v2115_v7 = vadd.f32 %v2114_v5, %v2113_v63  ;;  %v1647_v2 = vpop.f32.mrf.mxu2  ;;  %p2864_p5 = pnand %p2863_p3, %p2859_p0 }
 0x25b   : > { %v2217_v23 = vsel %vm2054_vm2, %v2172_v39, 0.0  ;;  %v1713_v14 = vadd.f32 %v1647_v2, %v1427_v58  ;;  %v1809_v6 = vpop.f32.mrf.mxu3  ;;  %v1364_v61 = vpop.f32.mrf.mxu1 }
 0x25c   : > { %v2218_v43 = vadd.f32 %v2217_v23, %v2216_v46  ;;  %v1428_v1 = vadd.f32 %v1364_v61, %v4352_v34 }
 0x25d   : > { %v1875_v26 = vadd.f32 %v1809_v6, %v1713_v14 }
 0x25e   : > { %v1974_v10 = vpop.f32.mrf.mxu0 }
 0x25f   : > { %v2037_v28 = vadd.f32 %v1971_v22, %v1875_v26 }
 0x261   : > { %2070 = vst.msk [vmem:[%s3932_s14 + $0x78] sm:$0xff] %vm2054_vm2, %v2037_v28  ;;  %v2116_v57 = vsel %vm2054_vm2, %v2037_v28, 0.0  ;;  %v2173_v35 = vmul.f32 %v2037_v28, %v2037_v28 }
 0x262   : > { %v2117_v29 = vadd.f32 %v2116_v57, %v2115_v7  ;;  %v1650_v49 = vpop.f32.mrf.mxu2 }
 0x263   : > { %v2219_v47 = vsel %vm2054_vm2, %v2173_v35, 0.0  ;;  %v1714_v51 = vadd.f32 %v1650_v49, %v1428_v1  ;;  %v1812_v42 = vpop.f32.mrf.mxu3  ;;  %v1367_v38 = vpop.f32.mrf.mxu1 }
 0x264   : > { %v2220_v11 = vadd.f32 %v2219_v47, %v2218_v43  ;;  %v1429_v18 = vadd.f32 %v1367_v38, %v4353_v13 }
 0x265   : > { %v1876_v53 = vadd.f32 %v1812_v42, %v1714_v51 }
 0x266   : > { %v1977_v19 = vpop.f32.mrf.mxu0 }
 0x267   : > { %v2038_v31 = vadd.f32 %v1974_v10, %v1876_v53 }
 0x269   : > { %2071 = vst.msk [vmem:[%s3932_s14 + $0x80] sm:$0xff] %vm2054_vm2, %v2038_v31  ;;  %v2118_v24 = vsel %vm2054_vm2, %v2038_v31, 0.0  ;;  %v2174_v40 = vmul.f32 %v2038_v31, %v2038_v31 }
 0x26a   : > { %v2119_v45 = vadd.f32 %v2118_v24, %v2117_v29  ;;  %v1653_v62 = vpop.f32.mrf.mxu2 }
 0x26b   : > { %v2221_v32 = vsel %vm2054_vm2, %v2174_v40, 0.0  ;;  %v1715_v21 = vadd.f32 %v1653_v62, %v1429_v18  ;;  %v1815_v16 = vpop.f32.mrf.mxu3  ;;  %v1370_v50 = vpop.f32.mrf.mxu1 }
 0x26c   : > { %v2222_v41 = vadd.f32 %v2221_v32, %v2220_v11  ;;  %v1430_v4 = vadd.f32 %v1370_v50, %v3737_v55 }
 0x26d   : > { %v1877_v63 = vadd.f32 %v1815_v16, %v1715_v21 }
 0x26e   : > { %v1980_v15 = vpop.f32.mrf.mxu0 }
 0x26f   : > { %v2039_v54 = vadd.f32 %v1977_v19, %v1877_v63 }
 0x271   : > { %2072 = vst.msk [vmem:[%s3932_s14 + $0x88] sm:$0xff] %vm2054_vm2, %v2039_v54  ;;  %v2120_v37 = vsel %vm2054_vm2, %v2039_v54, 0.0  ;;  %v2175_v46 = vmul.f32 %v2039_v54, %v2039_v54 }
 0x272   : > { %v2121_v60 = vadd.f32 %v2120_v37, %v2119_v45  ;;  %v1656_v56 = vpop.f32.mrf.mxu2 }
 0x273   : > { %v2223_v3 = vsel %vm2054_vm2, %v2175_v46, 0.0  ;;  %v1716_v22 = vadd.f32 %v1656_v56, %v1430_v4  ;;  %v1818_v25 = vpop.f32.mrf.mxu3  ;;  %v1373_v58 = vpop.f32.mrf.mxu1 }
 0x274   : > { %v2224_v33 = vadd.f32 %v2223_v3, %v2222_v41  ;;  %v1431_v2 = vadd.f32 %v1373_v58, %v3749_v20 }
 0x275   : > { %v1878_v5 = vadd.f32 %v1818_v25, %v1716_v22 }
 0x276   : > { %v1983_v39 = vpop.f32.mrf.mxu0 }
 0x277   : > { %v2040_v7 = vadd.f32 %v1980_v15, %v1878_v5 }
 0x279   : > { %2073 = vst.msk [vmem:[%s3932_s14 + $0x90] sm:$0xff] %vm2054_vm2, %v2040_v7  ;;  %v2122_v55 = vsel %vm2054_vm2, %v2040_v7, 0.0  ;;  %v2176_v23 = vmul.f32 %v2040_v7, %v2040_v7 }
 0x27a   : > { %v2123_v14 = vadd.f32 %v2122_v55, %v2121_v60  ;;  %v1659_v6 = vpop.f32.mrf.mxu2 }
 0x27b   : > { %v2225_v43 = vsel %vm2054_vm2, %v2176_v23, 0.0  ;;  %v1717_v61 = vadd.f32 %v1659_v6, %v1431_v2  ;;  %v1821_v26 = vpop.f32.mrf.mxu3  ;;  %v1376_v28 = vpop.f32.mrf.mxu1 }
 0x27c   : > { %v2226_v10 = vadd.f32 %v2225_v43, %v2224_v33  ;;  %v1432_v35 = vadd.f32 %v1376_v28, %v3763_v59 }
 0x27d   : > { %v1879_v34 = vadd.f32 %v1821_v26, %v1717_v61 }
 0x27e   : > { %v1986_v1 = vpop.f32.mrf.mxu0 }
 0x27f   : > { %v2041_v57 = vadd.f32 %v1983_v39, %v1879_v34 }
 0x281   : > { %2074 = vst.msk [vmem:[%s3932_s14 + $0x98] sm:$0xff] %vm2054_vm2, %v2041_v57  ;;  %v2124_v20 = vsel %vm2054_vm2, %v2041_v57, 0.0  ;;  %v2177_v29 = vmul.f32 %v2041_v57, %v2041_v57 }
 0x282   : > { %v2125_v49 = vadd.f32 %v2124_v20, %v2123_v14  ;;  %v1662_v47 = vpop.f32.mrf.mxu2 }
 0x283   : > { %v2227_v51 = vsel %vm2054_vm2, %v2177_v29, 0.0  ;;  %v1718_v42 = vadd.f32 %v1662_v47, %v1432_v35  ;;  %v1824_v11 = vpop.f32.mrf.mxu3  ;;  %v1379_v53 = vpop.f32.mrf.mxu1 }
 0x284   : > { %v2228_v38 = vadd.f32 %v2227_v51, %v2226_v10  ;;  %v1433_v18 = vadd.f32 %v1379_v53, %v3776_v0 }
 0x285   : > { %v1880_v19 = vadd.f32 %v1824_v11, %v1718_v42 }
 0x286   : > { %v1989_v31 = vpop.f32.mrf.mxu0 }
 0x287   : > { %v2042_v13 = vadd.f32 %v1986_v1, %v1880_v19 }
 0x289   : > { %2075 = vst.msk [vmem:[%s3932_s14 + $0xa0] sm:$0xff] %vm2054_vm2, %v2042_v13  ;;  %v2126_v59 = vsel %vm2054_vm2, %v2042_v13, 0.0  ;;  %v2178_v24 = vmul.f32 %v2042_v13, %v2042_v13 }
 0x28a   : > { %v2127_v40 = vadd.f32 %v2126_v59, %v2125_v49  ;;  %v1665_v45 = vpop.f32.mrf.mxu2 }
 0x28b   : > { %v2229_v62 = vsel %vm2054_vm2, %v2178_v24, 0.0  ;;  %v1719_v32 = vadd.f32 %v1665_v45, %v1433_v18  ;;  %v1827_v21 = vpop.f32.mrf.mxu3  ;;  %v1382_v41 = vpop.f32.mrf.mxu1 }
 0x28c   : > { %v2230_v16 = vadd.f32 %v2229_v62, %v2228_v38  ;;  %v1434_v54 = vadd.f32 %v1382_v41, %v3789_v8 }
 0x28d   : > { %v1881_v50 = vadd.f32 %v1827_v21, %v1719_v32 }
 0x28e   : > { %v1992_v63 = vpop.f32.mrf.mxu0 }
 0x28f   : > { %v2043_v15 = vadd.f32 %v1989_v31, %v1881_v50 }
 0x291   : > { %2076 = vst.msk [vmem:[%s3932_s14 + $0xa8] sm:$0xff] %vm2054_vm2, %v2043_v15  ;;  %v2128_v0 = vsel %vm2054_vm2, %v2043_v15, 0.0  ;;  %v2179_v4 = vmul.f32 %v2043_v15, %v2043_v15 }
 0x292   : > { %v2129_v37 = vadd.f32 %v2128_v0, %v2127_v40  ;;  %v1668_v46 = vpop.f32.mrf.mxu2 }
 0x293   : > { %v2231_v60 = vsel %vm2054_vm2, %v2179_v4, 0.0  ;;  %v1720_v56 = vadd.f32 %v1668_v46, %v1434_v54  ;;  %v1830_v3 = vpop.f32.mrf.mxu3  ;;  %v1385_v25 = vpop.f32.mrf.mxu1 }
 0x294   : > { %v2232_v22 = vadd.f32 %v2231_v60, %v2230_v16  ;;  %v1435_v39 = vadd.f32 %v1385_v25, %v3802_v12 }
 0x295   : > { %v1882_v33 = vadd.f32 %v1830_v3, %v1720_v56 }
 0x296   : > { %v1995_v58 = vpop.f32.mrf.mxu0 }
 0x297   : > { %v2044_v5 = vadd.f32 %v1992_v63, %v1882_v33 }
 0x299   : > { %2077 = vst.msk [vmem:[%s3932_s14 + $0xb0] sm:$0xff] %vm2054_vm2, %v2044_v5  ;;  %v2130_v8 = vsel %vm2054_vm2, %v2044_v5, 0.0  ;;  %v2180_v7 = vmul.f32 %v2044_v5, %v2044_v5 }
 0x29a   : > { %v2131_v2 = vadd.f32 %v2130_v8, %v2129_v37  ;;  %v1671_v55 = vpop.f32.mrf.mxu2 }
 0x29b   : > { %v2233_v23 = vsel %vm2054_vm2, %v2180_v7, 0.0  ;;  %v1721_v14 = vadd.f32 %v1671_v55, %v1435_v39  ;;  %v1833_v6 = vpop.f32.mrf.mxu3  ;;  %v1388_v61 = vpop.f32.mrf.mxu1 }
 0x29c   : > { %v2234_v43 = vadd.f32 %v2233_v23, %v2232_v22  ;;  %v1436_v34 = vadd.f32 %v1388_v61, %v3816_v36 }
 0x29d   : > { %v1883_v26 = vadd.f32 %v1833_v6, %v1721_v14 }
 0x29e   : > { %v1998_v10 = vpop.f32.mrf.mxu0 }
 0x29f   : > { %v2045_v28 = vadd.f32 %v1995_v58, %v1883_v26 }
 0x2a1   : > { %2078 = vst.msk [vmem:[%s3932_s14 + $0xb8] sm:$0xff] %vm2054_vm2, %v2045_v28  ;;  %v2132_v12 = vsel %vm2054_vm2, %v2045_v28, 0.0  ;;  %v2181_v1 = vmul.f32 %v2045_v28, %v2045_v28 }
 0x2a2   : > { %v2133_v57 = vadd.f32 %v2132_v12, %v2131_v2  ;;  %v1674_v35 = vpop.f32.mrf.mxu2 }
 0x2a3   : > { %v2235_v20 = vsel %vm2054_vm2, %v2181_v1, 0.0  ;;  %v1722_v29 = vadd.f32 %v1674_v35, %v1436_v34  ;;  %v1836_v49 = vpop.f32.mrf.mxu3  ;;  %v1391_v51 = vpop.f32.mrf.mxu1 }
 0x2a4   : > { %v2236_v47 = vadd.f32 %v2235_v20, %v2234_v43  ;;  %v1437_v53 = vadd.f32 %v1391_v51, %v3830_v44 }
 0x2a5   : > { %v1884_v42 = vadd.f32 %v1836_v49, %v1722_v29 }
 0x2a6   : > { %v2001_v11 = vpop.f32.mrf.mxu0 }
 0x2a7   : > { %v2046_v38 = vadd.f32 %v1998_v10, %v1884_v42 }
 0x2a9   : > { %2079 = vst.msk [vmem:[%s3932_s14 + $0xc0] sm:$0xff] %vm2054_vm2, %v2046_v38  ;;  %v2134_v36 = vsel %vm2054_vm2, %v2046_v38, 0.0  ;;  %v2182_v19 = vmul.f32 %v2046_v38, %v2046_v38 }
 0x2aa   : > { %v2135_v31 = vadd.f32 %v2134_v36, %v2133_v57  ;;  %v1677_v13 = vpop.f32.mrf.mxu2 }
 0x2ab   : > { %v2237_v18 = vsel %vm2054_vm2, %v2182_v19, 0.0  ;;  %v1723_v59 = vadd.f32 %v1677_v13, %v1437_v53  ;;  %v1839_v24 = vpop.f32.mrf.mxu3  ;;  %v1394_v45 = vpop.f32.mrf.mxu1 }
 0x2ac   : > { %v2238_v40 = vadd.f32 %v2237_v18, %v2236_v47  ;;  %v1438_v16 = vadd.f32 %v1394_v45, %v3844_v48 }
 0x2ad   : > { %v1885_v62 = vadd.f32 %v1839_v24, %v1723_v59 }
 0x2ae   : > { %v2004_v32 = vpop.f32.mrf.mxu0 }
 0x2af   : > { %v2047_v21 = vadd.f32 %v2001_v11, %v1885_v62 }
 0x2b1   : > { %2080 = vst.msk [vmem:[%s3932_s14 + $0xc8] sm:$0xff] %vm2054_vm2, %v2047_v21  ;;  %v2136_v44 = vsel %vm2054_vm2, %v2047_v21, 0.0  ;;  %v2183_v41 = vmul.f32 %v2047_v21, %v2047_v21 }
 0x2b2   : > { %v2137_v50 = vadd.f32 %v2136_v44, %v2135_v31  ;;  %v1680_v63 = vpop.f32.mrf.mxu2 }
 0x2b3   : > { %v2239_v15 = vsel %vm2054_vm2, %v2183_v41, 0.0  ;;  %v1724_v54 = vadd.f32 %v1680_v63, %v1438_v16  ;;  %v1842_v0 = vpop.f32.mrf.mxu3  ;;  %v1397_v37 = vpop.f32.mrf.mxu1 }
 0x2b4   : > { %v2240_v4 = vadd.f32 %v2239_v15, %v2238_v40  ;;  %v1439_v3 = vadd.f32 %v1397_v37, %v3858_v52 }
 0x2b5   : > { %v1886_v46 = vadd.f32 %v1842_v0, %v1724_v54 }
 0x2b6   : > { %v2007_v60 = vpop.f32.mrf.mxu0 }
 0x2b7   : > { %v2048_v56 = vadd.f32 %v2004_v32, %v1886_v46 }
 0x2b9   : > { %2081 = vst.msk [vmem:[%s3932_s14 + $0xd0] sm:$0xff] %vm2054_vm2, %v2048_v56  ;;  %v2138_v48 = vsel %vm2054_vm2, %v2048_v56, 0.0  ;;  %v2184_v22 = vmul.f32 %v2048_v56, %v2048_v56 }
 0x2ba   : > { %v2139_v25 = vadd.f32 %v2138_v48, %v2137_v50  ;;  %v1683_v33 = vpop.f32.mrf.mxu2 }
 0x2bb   : > { %v2241_v58 = vsel %vm2054_vm2, %v2184_v22, 0.0  ;;  %v1725_v5 = vadd.f32 %v1683_v33, %v1439_v3  ;;  %v1845_v39 = vpop.f32.mrf.mxu3  ;;  %v1400_v7 = vpop.f32.mrf.mxu1 }
 0x2bc   : > { %v2242_v8 = vadd.f32 %v2241_v58, %v2240_v4  ;;  %v1440_v14 = vadd.f32 %v1400_v7, %v3872_v27 }
 0x2bd   : > { %v1887_v2 = vadd.f32 %v1845_v39, %v1725_v5 }
 0x2be   : > { %v2010_v55 = vpop.f32.mrf.mxu0 }
 0x2bf   : > { %v2049_v23 = vadd.f32 %v2007_v60, %v1887_v2 }
 0x2c1   : > { %2082 = vst.msk [vmem:[%s3932_s14 + $0xd8] sm:$0xff] %vm2054_vm2, %v2049_v23  ;;  %v2140_v52 = vsel %vm2054_vm2, %v2049_v23, 0.0  ;;  %v2185_v6 = vmul.f32 %v2049_v23, %v2049_v23 }
 0x2c2   : > { %v2141_v43 = vadd.f32 %v2140_v52, %v2139_v25  ;;  %v1686_v61 = vpop.f32.mrf.mxu2 }
 0x2c3   : > { %v2243_v26 = vsel %vm2054_vm2, %v2185_v6, 0.0  ;;  %v1726_v10 = vadd.f32 %v1686_v61, %v1440_v14  ;;  %v1848_v28 = vpop.f32.mrf.mxu3  ;;  %v1403_v12 = vpop.f32.mrf.mxu1 }
 0x2c4   : > { %v2244_v34 = vadd.f32 %v2243_v26, %v2242_v8  ;;  %v1441_v20 = vadd.f32 %v1403_v12, %v3886_v9 }
 0x2c5   : > { %v1888_v1 = vadd.f32 %v1848_v28, %v1726_v10 }
 0x2c6   : > { %v2013_v35 = vpop.f32.mrf.mxu0 }
 0x2c7   : > { %v2050_v57 = vadd.f32 %v2010_v55, %v1888_v1 }
 0x2c9   : > { %2083 = vst.msk [vmem:[%s3932_s14 + $0xe0] sm:$0xff] %vm2054_vm2, %v2050_v57  ;;  %v2142_v27 = vsel %vm2054_vm2, %v2050_v57, 0.0  ;;  %v2186_v29 = vmul.f32 %v2050_v57, %v2050_v57 }
 0x2ca   : > { %v2143_v49 = vadd.f32 %v2142_v27, %v2141_v43  ;;  %v1689_v47 = vpop.f32.mrf.mxu2 }
 0x2cb   : > { %v2245_v51 = vsel %vm2054_vm2, %v2186_v29, 0.0  ;;  %v1727_v42 = vadd.f32 %v1689_v47, %v1441_v20  ;;  %v1851_v11 = vpop.f32.mrf.mxu3  ;;  %v1406_v53 = vpop.f32.mrf.mxu1 }
 0x2cc   : > { %v2246_v38 = vadd.f32 %v2245_v51, %v2244_v34  ;;  %v1442_v31 = vadd.f32 %v1406_v53, %v3900_v17 }
 0x2cd   : > { %v1889_v36 = vadd.f32 %v1851_v11, %v1727_v42 }
 0x2ce   : > { %v2016_v24 = vpop.f32.mrf.mxu0 }
 0x2cf   : > { %v2051_v19 = vadd.f32 %v2013_v35, %v1889_v36 }
 0x2d1   : > { %2084 = vst.msk [vmem:[%s3932_s14 + $0xe8] sm:$0xff] %vm2054_vm2, %v2051_v19  ;;  %v2144_v9 = vsel %vm2054_vm2, %v2051_v19, 0.0  ;;  %v2187_v13 = vmul.f32 %v2051_v19, %v2051_v19 }
 0x2d2   : > { %v2145_v18 = vadd.f32 %v2144_v9, %v2143_v49  ;;  %v1692_v59 = vpop.f32.mrf.mxu2 }
 0x2d3   : > { %v2247_v40 = vsel %vm2054_vm2, %v2187_v13, 0.0  ;;  %v1728_v45 = vadd.f32 %v1692_v59, %v1442_v31  ;;  %v1854_v62 = vpop.f32.mrf.mxu3  ;;  %v1409_v16 = vpop.f32.mrf.mxu1 }
 0x2d4   : > { %v2248_v32 = vadd.f32 %v2247_v40, %v2246_v38  ;;  %v1443_v41 = vadd.f32 %v1409_v16, %v3914_v30 }
 0x2d5   : > { %v1890_v21 = vadd.f32 %v1854_v62, %v1728_v45 }
 0x2d6   : > { %v2019_v46 = vpop.f32.mrf.mxu0 }
 0x2d7   : > { %v2052_v44 = vadd.f32 %v2016_v24, %v1890_v21 }
 0x2d9   : > { %2085 = vst.msk [vmem:[%s3932_s14 + $0xf0] sm:$0xff] %vm2054_vm2, %v2052_v44  ;;  %v2146_v17 = vsel %vm2054_vm2, %v2052_v44, 0.0  ;;  %v2188_v50 = vmul.f32 %v2052_v44, %v2052_v44 }
 0x2da   : > { %v2147_v63 = vadd.f32 %v2146_v17, %v2145_v18  ;;  %v1695_v15 = vpop.f32.mrf.mxu2 }
 0x2db   : > { %v2249_v54 = vsel %vm2054_vm2, %v2188_v50, 0.0  ;;  %v1729_v0 = vadd.f32 %v1695_v15, %v1443_v41  ;;  %v1857_v4 = vpop.f32.mrf.mxu3 }
 0x2dc   : > { %v2250_v37 = vadd.f32 %v2249_v54, %v2248_v32 }
 0x2dd   : > { %v1891_v60 = vadd.f32 %v1857_v4, %v1729_v0 }
 0x2df   : > { %v2053_v56 = vadd.f32 %v2019_v46, %v1891_v60 }
 0x2e1   : > { %2086 = vst.msk [vmem:[%s3932_s14 + $0xf8] sm:$0xff] %vm2054_vm2, %v2053_v56  ;;  %v2148_v30 = vsel %vm2054_vm2, %v2053_v56, 0.0  ;;  %v2189_v3 = vmul.f32 %v2053_v56, %v2053_v56 }
 0x2e2   : > { %v2149_v48 = vadd.f32 %v2148_v30, %v2147_v63 }
 0x2e3   : > { %v2251_v22 = vsel %vm2054_vm2, %v2189_v3, 0.0 }
 0x2e4   : > { %v2150_v25 = vrot.slane %v2149_v48, 4  ;;  %v2252_v33 = vadd.f32 %v2251_v22, %v2250_v37 }
 0x2e6   : > { %v2151_v58 = vadd.f32 %v2150_v25, %v2149_v48  ;;  %v2253_v5 = vrot.slane %v2252_v33, 4 }
 0x2e8   : > { %v2152_v39 = vrot.slane %v2151_v58, 2  ;;  %v2254_v8 = vadd.f32 %v2253_v5, %v2252_v33 }
 0x2ea   : > { %v2153_v7 = vadd.f32 %v2152_v39, %v2151_v58  ;;  %v2255_v2 = vrot.slane %v2254_v8, 2 }
 0x2ec   : > { %v2154_v55 = vrot.slane %v2153_v7, 1  ;;  %v2256_v23 = vadd.f32 %v2255_v2, %v2254_v8 }
 0x2ee   : > { %v2155_v14 = vadd.f32 %v2154_v55, %v2153_v7  ;;  %v2257_v52 = vrot.slane %v2256_v23, 1 }
 0x2f0   : > { %2157 = vst.msk [vmem:[%s257_s5] sm:$0x1] %vm2156_vm3, %v2155_v14  ;;  %v2258_v6 = vadd.f32 %v2257_v52, %v2256_v23 }
 0x2f1   : > { %2867 = shalt.err (!%p2864_p5)
}
 0x2f2   : > { %2780 = dma.vmem_to_hbm [thread:$0]  (%p3017_p4), %s2288_s6, 16, %s2290_s7, %s2269_s18   ;;  %2259 = vst.msk [vmem:[%s263_s8] sm:$0x1] %vm2156_vm3, %v2258_v6 }
 0x2f3   : > { %s2273_s29 = scalar_lea.sflag [#allocation5], %s4244_s11  ;;  %s2882_s30 = sshra.s32 %s2304_s10, 4  ;;  %s2883_s30 = int_to_ptr.hbm [resolvable:$true] %s2882_s30 }
 0x2f4   : > { %s2884_s5 = scalar_lea.hbm %s2883_s30, 1  ;;  %s2888_s14 = scalar_lea.hbm %s4324_s4, 2 }
 0x2f5   : > { %p2885_p6 = scmp.ne.s32.totalorder %s2883_s30, %s2884_s5  ;;  %p2889_p10 = scmp.lt.s32.totalorder %s2883_s30, %s4324_s4 }
 0x2f6   : > { %p2890_p11 = scmp.lt.s32.totalorder %s2888_s14, %s2884_s5 }
 0x2f7   : > { %p2886_p7 = pnand %p2885_p6, %p3017_p4 }
 0x2f8   : > { %p2891_p12 = por %p2890_p11, %p2889_p10 }
 0x2f9   : > { %p2887_p9 = pneg %p2886_p7 }
 0x2fb   : > { %p2892_p13 = pnand %p2891_p12, %p2887_p9 }
 0x2fd   : > { %2895 = shalt.err (!%p2892_p13)
}
 0x2fe   : > { %2781 = dma.vmem_to_hbm [thread:$0]  (%p3017_p4), %s2302_s9, 16, %s2304_s10, %s2273_s29  }
 0x2ff PF: > { %p2791_p0 = scmp.ge.s32.totalorder %s2950_s20, 2  ;;  %s2326_s11 = sand.u32 1, %s2930_s15  }
 0x300   : > { %s2327_s6 = scalar_lea.sflag [#allocation3], %s2326_s11 }
 0x301   : > { %p2785_p1 = pnand %p2791_p0, %p3024_p8 }
 0x303   : > { %p2786_p2 = pneg %p2785_p1 }
 0x305   : > { %2921 = dma.done.wait (%p2786_p2), %s2327_s6, 16  }
 0x306   : > { %2923 = vsyncadd (%p2786_p2), %s2327_s6, 4294967280  ;;  %s2336_s7 = scalar_lea.sflag [#allocation5], %s2326_s11 }
 0x307   : > { %2925 = dma.done.wait (%p2786_p2), %s2336_s7, 16  }
 0x308   : > { %2927 = vsyncadd (%p2786_p2), %s2336_s7, 4294967280  ;;  %s21_s20 = sadd.s32 1, %s2950_s20   ;;  %s4354_s15 = smov %s2934_s16 }
 0x309   : > { %p18_p3 = scmp.ge.s32.totalorder %s21_s20, 4   ;;  %s4355_s16 = smov %s2938_s17 }
 0x30a   : > { %s4356_s17 = smov %s3030_s28  ;;  %s4357_s18 = smov %s2946_s19 }
 0x30b   : > { %s4358_s19 = smov %s4360_s23  ;;  %20 = sbr.rel (!%p18_p3) target bundleno = 6 (0x6), region = 103 }
 0x310   :  { %2341 = vsyncpa [#allocation3], 1 }
 0x311   :  { %2343 = vsyncpa [#allocation3 + $0x1], 1 }
 0x312   :  { %2344 = vsyncpa [#allocation5], 1 }
 0x313   :  { %2346 = vsyncpa [#allocation5 + $0x1], 1 }

</bundles_post_ra>
